<compile_context>
chip_gen: v7x
topology: tpu7x:2x2x1
jax: 0.10.0
libtpu: 0.0.40
codegen_flags: <defaults>
</compile_context>

<pallas_src>
import jax
import jax.numpy as jnp
from jax.experimental import pallas as pl
from jax.experimental.pallas import tpu as pltpu


# ----------------------------- Pallas kernels ------------------------------

def _conv_relu_pool_kernel(p_ref, w_ref, b_ref, o_ref):
    """Fused conv-as-matmul + bias + ReLU + 2x2 maxpool (transposed form).

    p_ref: (4, F, N) bf16 -- pool-grouped, transposed im2col patches.
           axis 0 = slot inside the 2x2 pool window,
           F = (padded) Cin*K*K contraction dim, N = B*PH*PW pooled pixels.
    w_ref: (Cout, F) bf16, b_ref: (Cout, 1) f32, o_ref: (Cout, N) bf16.
    """
    w = w_ref[...]
    b = b_ref[...]

    def window(p):
        y = jnp.dot(w, p_ref[p], preferred_element_type=jnp.float32)  # (Cout, N)
        return jnp.maximum(y + b, 0.0)

    # ReLU is monotone, so max-of-relu == relu-of-max; pairwise max runs on VPU.
    out = jnp.maximum(jnp.maximum(window(0), window(1)),
                      jnp.maximum(window(2), window(3)))
    o_ref[...] = out.astype(o_ref.dtype)


def _mlp3_kernel(x_ref, w1_ref, b1_ref, w2_ref, b2_ref, w3_ref, b3_ref, o_ref):
    """Fused fc1+ReLU -> fc2+ReLU -> fc3+ReLU; intermediates never leave VMEM."""
    h = jnp.dot(x_ref[...], w1_ref[...], preferred_element_type=jnp.float32)
    h = jnp.maximum(h + b1_ref[...], 0.0)
    h = jnp.dot(h.astype(w2_ref.dtype), w2_ref[...],
                preferred_element_type=jnp.float32)
    h = jnp.maximum(h + b2_ref[...], 0.0)
    h = jnp.dot(h.astype(w3_ref.dtype), w3_ref[...],
                preferred_element_type=jnp.float32)
    h = jnp.maximum(h + b3_ref[...], 0.0)   # final ReLU per the reference module
    o_ref[...] = h.astype(o_ref.dtype)


def _vmem():
    return pl.BlockSpec(memory_space=pltpu.MemorySpace.VMEM)


def conv_relu_pool(patches_t, w2d, b_col):
    _, _, n = patches_t.shape
    cout = w2d.shape[0]
    return pl.pallas_call(
        _conv_relu_pool_kernel,
        out_shape=jax.ShapeDtypeStruct((cout, n), jnp.bfloat16),
        in_specs=[_vmem(), _vmem(), _vmem()],
        out_specs=_vmem(),
    )(patches_t, w2d, b_col)


def mlp3(x, w1, b1, w2, b2, w3, b3):
    return pl.pallas_call(
        _mlp3_kernel,
        out_shape=jax.ShapeDtypeStruct((x.shape[0], w3.shape[1]), jnp.float32),
        in_specs=[_vmem() for _ in range(7)],
        out_specs=_vmem(),
    )(x, w1, b1, w2, b2, w3, b3)


# ------------------------------- JAX glue -----------------------------------

def _pool_grouped_patches_t(x_nchw, k, f_pad=None):
    """im2col + pool grouping, transposed: (B,Cin,H,W) -> (4, F[pad], B*PH*PW) bf16.

    Feature order along F is (ci, ki, kj), matching torch's
    conv_w.reshape(Cout, Cin*k*k). Axis 0 is the 2x2-pool slot di*2+dj for the
    conv-output pixel (2*ph+di, 2*pw+dj). Tiny at B=2; pure XLA glue.
    """
    b, cin, h, w = x_nchw.shape
    oh, ow = h - k + 1, w - k + 1
    ph, pw = oh // 2, ow // 2
    cols = [x_nchw[:, :, ki:ki + oh, kj:kj + ow]
            for ki in range(k) for kj in range(k)]
    p = jnp.stack(cols, axis=2)                      # (B, Cin, k*k, OH, OW)
    f = cin * k * k
    p = p.reshape(b, f, oh, ow)                      # feature = ci*k*k + ki*k + kj
    p = p.reshape(b, f, ph, 2, pw, 2)                # split 2x2 pool windows
    p = p.transpose(3, 5, 1, 0, 2, 4)                # (di, dj, F, B, PH, PW)
    p = p.reshape(4, f, b * ph * pw)
    if f_pad is not None and f_pad > f:
        p = jnp.pad(p, ((0, 0), (0, f_pad - f), (0, 0)))
    return p.astype(jnp.bfloat16), ph, pw


# --------------------------- Parameters / forward ----------------------------

def _uniform(key, shape, fan_in):
    bound = 1.0 / jnp.sqrt(jnp.asarray(fan_in, jnp.float32))
    return jax.random.uniform(key, shape, jnp.float32, -bound, bound)


def init_params(key):
    ks = jax.random.split(key, 10)
    p = {}
    # conv1: Conv2d(3, 32, kernel_size=5); conv2: Conv2d(32, 16, kernel_size=5)
    p["conv1_w"] = _uniform(ks[0], (32, 3, 5, 5), 3 * 5 * 5)
    p["conv1_b"] = _uniform(ks[1], (32,), 3 * 5 * 5)
    p["conv2_w"] = _uniform(ks[2], (16, 32, 5, 5), 32 * 5 * 5)
    p["conv2_b"] = _uniform(ks[3], (16,), 32 * 5 * 5)
    # fc1: Linear(400, 64); fc2: Linear(64, 32); fc3: Linear(32, 10)
    p["fc1_w"] = _uniform(ks[4], (64, 400), 400)
    p["fc1_b"] = _uniform(ks[5], (64,), 400)
    p["fc2_w"] = _uniform(ks[6], (32, 64), 64)
    p["fc2_b"] = _uniform(ks[7], (32,), 64)
    p["fc3_w"] = _uniform(ks[8], (10, 32), 32)
    p["fc3_b"] = _uniform(ks[9], (10,), 32)
    return p


_CONV1_F_PAD = 128   # pad conv1 contraction dim 3*5*5 = 75 up to a full 128 lanes


def prepare_params(p):
    """Reshape / pad / pre-cast PyTorch-layout weights into kernel-ready form."""
    w1 = p["conv1_w"].reshape(32, 75)
    w1 = jnp.pad(w1, ((0, 0), (0, _CONV1_F_PAD - 75))).astype(jnp.bfloat16)
    return {
        "w1": w1,                                                   # (32, 128) bf16
        "b1": p["conv1_b"].reshape(32, 1).astype(jnp.float32),
        "w2": p["conv2_w"].reshape(16, 800).astype(jnp.bfloat16),   # (16, 800) bf16
        "b2": p["conv2_b"].reshape(16, 1).astype(jnp.float32),
        "f1": p["fc1_w"].T.astype(jnp.bfloat16),                    # (400, 64)
        "fb1": p["fc1_b"].reshape(1, -1).astype(jnp.float32),
        "f2": p["fc2_w"].T.astype(jnp.bfloat16),                    # (64, 32)
        "fb2": p["fc2_b"].reshape(1, -1).astype(jnp.float32),
        "f3": p["fc3_w"].T.astype(jnp.bfloat16),                    # (32, 10)
        "fb3": p["fc3_b"].reshape(1, -1).astype(jnp.float32),
    }


def mycnn_forward(prep, x):
    """x: (B, 3, 32, 32) NCHW float32 -> (B, 10) (ReLU'd logits, per the module)."""
    b = x.shape[0]
    # Stage 1: conv1(5x5) + ReLU + maxpool2x2 -> one fused kernel.
    p1, ph1, pw1 = _pool_grouped_patches_t(x, 5, f_pad=_CONV1_F_PAD)
    y1 = conv_relu_pool(p1, prep["w1"], prep["b1"])           # (32, B*14*14) bf16
    x1 = y1.reshape(32, b, ph1, pw1).transpose(1, 0, 2, 3)    # NCHW (B, 32, 14, 14)
    # Stage 2: conv2(5x5) + ReLU + maxpool2x2 -> one fused kernel.
    p2, ph2, pw2 = _pool_grouped_patches_t(x1, 5)
    y2 = conv_relu_pool(p2, prep["w2"], prep["b2"])           # (16, B*5*5) bf16
    # Flatten in torch NCHW order (index = c*25 + h*5 + w) to feed fc1.
    feats = y2.reshape(16, b, ph2 * pw2).transpose(1, 0, 2).reshape(b, 16 * ph2 * pw2)
    # Stage 3: fc1+ReLU -> fc2+ReLU -> fc3+ReLU -> one fused kernel.
    return mlp3(feats, prep["f1"], prep["fb1"], prep["f2"], prep["fb2"],
                prep["f3"], prep["fb3"])


if __name__ == "__main__":
    key = jax.random.PRNGKey(0)
    pkey, xkey = jax.random.split(key)
    params = init_params(pkey)
    prep = prepare_params(params)
    # CIFAR-sized input (3x32x32) is required by fc1's 400 = 16*5*5 input features.
    x = jax.random.normal(xkey, (2, 3, 32, 32), dtype=jnp.float32)

    out = jax.jit(mycnn_forward)(prep, x)
    out = jax.block_until_ready(out)
    assert out.shape == (2, 10), out.shape
    assert bool(jnp.all(out >= 0.0))   # reference module applies ReLU after fc3
    print("KERNEL_OK")
</pallas_src>

<mosaic_0001>
module attributes {stable_mosaic.version = 11 : i64} {
  func.func @_conv_relu_pool_kernel(%arg0: memref<4x128x392xbf16, #tpu.memory_space<vmem>>, %arg1: memref<32x128xbf16, #tpu.memory_space<vmem>>, %arg2: memref<32x1xf32, #tpu.memory_space<vmem>>, %arg3: memref<32x392xbf16, #tpu.memory_space<vmem>>) attributes {dimension_semantics = [], scalar_prefetch = 0 : i64, scratch_operands = 0 : i64, tpu.core_type = #tpu.core_type<tc>} {
    %c0 = arith.constant 0 : index
    %c0_0 = arith.constant 0 : index
    %0 = vector.load %arg1[%c0, %c0_0] : memref<32x128xbf16, #tpu.memory_space<vmem>>, vector<32x128xbf16>
    %c0_1 = arith.constant 0 : index
    %c0_2 = arith.constant 0 : index
    %1 = vector.load %arg2[%c0_1, %c0_2] : memref<32x1xf32, #tpu.memory_space<vmem>>, vector<32x1xf32>
    %c0_3 = arith.constant 0 : index
    %c0_4 = arith.constant 0 : index
    %c0_5 = arith.constant 0 : index
    %2 = vector.load %arg0[%c0_3, %c0_4, %c0_5] : memref<4x128x392xbf16, #tpu.memory_space<vmem>>, vector<1x128x392xbf16>
    %3 = vector.shape_cast %2 : vector<1x128x392xbf16> to vector<128x392xbf16>
    %cst = arith.constant dense<0.000000e+00> : vector<32x392xf32>
    %4 = tpu.matmul %0, %3, %cst {dimension_numbers = #tpu.dot_dimension_numbers<[1], [0], [0], [1], [0, 0, 1, 1], [], []>} : vector<32x128xbf16>, vector<128x392xbf16>, vector<32x392xf32> -> vector<32x392xf32>
    %5 = vector.broadcast %1 : vector<32x1xf32> to vector<32x392xf32>
    %6 = arith.addf %4, %5 : vector<32x392xf32>
    %cst_6 = arith.constant 0.000000e+00 : f32
    %7 = vector.broadcast %cst_6 : f32 to vector<32x392xf32>
    %8 = arith.maximumf %6, %7 : vector<32x392xf32>
    %c1 = arith.constant 1 : index
    %c0_7 = arith.constant 0 : index
    %c0_8 = arith.constant 0 : index
    %9 = vector.load %arg0[%c1, %c0_7, %c0_8] : memref<4x128x392xbf16, #tpu.memory_space<vmem>>, vector<1x128x392xbf16>
    %10 = vector.shape_cast %9 : vector<1x128x392xbf16> to vector<128x392xbf16>
    %cst_9 = arith.constant dense<0.000000e+00> : vector<32x392xf32>
    %11 = tpu.matmul %0, %10, %cst_9 {dimension_numbers = #tpu.dot_dimension_numbers<[1], [0], [0], [1], [0, 0, 1, 1], [], []>} : vector<32x128xbf16>, vector<128x392xbf16>, vector<32x392xf32> -> vector<32x392xf32>
    %12 = vector.broadcast %1 : vector<32x1xf32> to vector<32x392xf32>
    %13 = arith.addf %11, %12 : vector<32x392xf32>
    %cst_10 = arith.constant 0.000000e+00 : f32
    %14 = vector.broadcast %cst_10 : f32 to vector<32x392xf32>
    %15 = arith.maximumf %13, %14 : vector<32x392xf32>
    %16 = arith.maximumf %8, %15 : vector<32x392xf32>
    %c2 = arith.constant 2 : index
    %c0_11 = arith.constant 0 : index
    %c0_12 = arith.constant 0 : index
    %17 = vector.load %arg0[%c2, %c0_11, %c0_12] : memref<4x128x392xbf16, #tpu.memory_space<vmem>>, vector<1x128x392xbf16>
    %18 = vector.shape_cast %17 : vector<1x128x392xbf16> to vector<128x392xbf16>
    %cst_13 = arith.constant dense<0.000000e+00> : vector<32x392xf32>
    %19 = tpu.matmul %0, %18, %cst_13 {dimension_numbers = #tpu.dot_dimension_numbers<[1], [0], [0], [1], [0, 0, 1, 1], [], []>} : vector<32x128xbf16>, vector<128x392xbf16>, vector<32x392xf32> -> vector<32x392xf32>
    %20 = vector.broadcast %1 : vector<32x1xf32> to vector<32x392xf32>
    %21 = arith.addf %19, %20 : vector<32x392xf32>
    %cst_14 = arith.constant 0.000000e+00 : f32
    %22 = vector.broadcast %cst_14 : f32 to vector<32x392xf32>
    %23 = arith.maximumf %21, %22 : vector<32x392xf32>
    %c3 = arith.constant 3 : index
    %c0_15 = arith.constant 0 : index
    %c0_16 = arith.constant 0 : index
    %24 = vector.load %arg0[%c3, %c0_15, %c0_16] : memref<4x128x392xbf16, #tpu.memory_space<vmem>>, vector<1x128x392xbf16>
    %25 = vector.shape_cast %24 : vector<1x128x392xbf16> to vector<128x392xbf16>
    %cst_17 = arith.constant dense<0.000000e+00> : vector<32x392xf32>
    %26 = tpu.matmul %0, %25, %cst_17 {dimension_numbers = #tpu.dot_dimension_numbers<[1], [0], [0], [1], [0, 0, 1, 1], [], []>} : vector<32x128xbf16>, vector<128x392xbf16>, vector<32x392xf32> -> vector<32x392xf32>
    %27 = vector.broadcast %1 : vector<32x1xf32> to vector<32x392xf32>
    %28 = arith.addf %26, %27 : vector<32x392xf32>
    %cst_18 = arith.constant 0.000000e+00 : f32
    %29 = vector.broadcast %cst_18 : f32 to vector<32x392xf32>
    %30 = arith.maximumf %28, %29 : vector<32x392xf32>
    %31 = arith.maximumf %23, %30 : vector<32x392xf32>
    %32 = arith.maximumf %16, %31 : vector<32x392xf32>
    %33 = arith.truncf %32 : vector<32x392xf32> to vector<32x392xbf16>
    %c0_19 = arith.constant 0 : index
    %c0_20 = arith.constant 0 : index
    %34 = vector.load %arg3[%c0_19, %c0_20] : memref<32x392xbf16, #tpu.memory_space<vmem>>, vector<32x392xbf16>
    tpu.vector_store %arg3[%c0_19, %c0_20], %33 {strides = array<i32>} : memref<32x392xbf16, #tpu.memory_space<vmem>>, vector<32x392xbf16>,
    return
  }
}

module attributes {stable_mosaic.version = 11 : i64} {
  func.func @_conv_relu_pool_kernel(%arg0: memref<4x800x50xbf16, #tpu.memory_space<vmem>>, %arg1: memref<16x800xbf16, #tpu.memory_space<vmem>>, %arg2: memref<16x1xf32, #tpu.memory_space<vmem>>, %arg3: memref<16x50xbf16, #tpu.memory_space<vmem>>) attributes {dimension_semantics = [], scalar_prefetch = 0 : i64, scratch_operands = 0 : i64, tpu.core_type = #tpu.core_type<tc>} {
    %c0 = arith.constant 0 : index
    %c0_0 = arith.constant 0 : index
    %0 = vector.load %arg1[%c0, %c0_0] : memref<16x800xbf16, #tpu.memory_space<vmem>>, vector<16x800xbf16>
    %c0_1 = arith.constant 0 : index
    %c0_2 = arith.constant 0 : index
    %1 = vector.load %arg2[%c0_1, %c0_2] : memref<16x1xf32, #tpu.memory_space<vmem>>, vector<16x1xf32>
    %c0_3 = arith.constant 0 : index
    %c0_4 = arith.constant 0 : index
    %c0_5 = arith.constant 0 : index
    %2 = vector.load %arg0[%c0_3, %c0_4, %c0_5] : memref<4x800x50xbf16, #tpu.memory_space<vmem>>, vector<1x800x50xbf16>
    %3 = vector.shape_cast %2 : vector<1x800x50xbf16> to vector<800x50xbf16>
    %cst = arith.constant dense<0.000000e+00> : vector<16x50xf32>
    %4 = tpu.matmul %0, %3, %cst {dimension_numbers = #tpu.dot_dimension_numbers<[1], [0], [0], [1], [0, 0, 1, 1], [], []>} : vector<16x800xbf16>, vector<800x50xbf16>, vector<16x50xf32> -> vector<16x50xf32>
    %5 = vector.broadcast %1 : vector<16x1xf32> to vector<16x50xf32>
    %6 = arith.addf %4, %5 : vector<16x50xf32>
    %cst_6 = arith.constant 0.000000e+00 : f32
    %7 = vector.broadcast %cst_6 : f32 to vector<16x50xf32>
    %8 = arith.maximumf %6, %7 : vector<16x50xf32>
    %c1 = arith.constant 1 : index
    %c0_7 = arith.constant 0 : index
    %c0_8 = arith.constant 0 : index
    %9 = vector.load %arg0[%c1, %c0_7, %c0_8] : memref<4x800x50xbf16, #tpu.memory_space<vmem>>, vector<1x800x50xbf16>
    %10 = vector.shape_cast %9 : vector<1x800x50xbf16> to vector<800x50xbf16>
    %cst_9 = arith.constant dense<0.000000e+00> : vector<16x50xf32>
    %11 = tpu.matmul %0, %10, %cst_9 {dimension_numbers = #tpu.dot_dimension_numbers<[1], [0], [0], [1], [0, 0, 1, 1], [], []>} : vector<16x800xbf16>, vector<800x50xbf16>, vector<16x50xf32> -> vector<16x50xf32>
    %12 = vector.broadcast %1 : vector<16x1xf32> to vector<16x50xf32>
    %13 = arith.addf %11, %12 : vector<16x50xf32>
    %cst_10 = arith.constant 0.000000e+00 : f32
    %14 = vector.broadcast %cst_10 : f32 to vector<16x50xf32>
    %15 = arith.maximumf %13, %14 : vector<16x50xf32>
    %16 = arith.maximumf %8, %15 : vector<16x50xf32>
    %c2 = arith.constant 2 : index
    %c0_11 = arith.constant 0 : index
    %c0_12 = arith.constant 0 : index
    %17 = vector.load %arg0[%c2, %c0_11, %c0_12] : memref<4x800x50xbf16, #tpu.memory_space<vmem>>, vector<1x800x50xbf16>
    %18 = vector.shape_cast %17 : vector<1x800x50xbf16> to vector<800x50xbf16>
    %cst_13 = arith.constant dense<0.000000e+00> : vector<16x50xf32>
    %19 = tpu.matmul %0, %18, %cst_13 {dimension_numbers = #tpu.dot_dimension_numbers<[1], [0], [0], [1], [0, 0, 1, 1], [], []>} : vector<16x800xbf16>, vector<800x50xbf16>, vector<16x50xf32> -> vector<16x50xf32>
    %20 = vector.broadcast %1 : vector<16x1xf32> to vector<16x50xf32>
    %21 = arith.addf %19, %20 : vector<16x50xf32>
    %cst_14 = arith.constant 0.000000e+00 : f32
    %22 = vector.broadcast %cst_14 : f32 to vector<16x50xf32>
    %23 = arith.maximumf %21, %22 : vector<16x50xf32>
    %c3 = arith.constant 3 : index
    %c0_15 = arith.constant 0 : index
    %c0_16 = arith.constant 0 : index
    %24 = vector.load %arg0[%c3, %c0_15, %c0_16] : memref<4x800x50xbf16, #tpu.memory_space<vmem>>, vector<1x800x50xbf16>
    %25 = vector.shape_cast %24 : vector<1x800x50xbf16> to vector<800x50xbf16>
    %cst_17 = arith.constant dense<0.000000e+00> : vector<16x50xf32>
    %26 = tpu.matmul %0, %25, %cst_17 {dimension_numbers = #tpu.dot_dimension_numbers<[1], [0], [0], [1], [0, 0, 1, 1], [], []>} : vector<16x800xbf16>, vector<800x50xbf16>, vector<16x50xf32> -> vector<16x50xf32>
    %27 = vector.broadcast %1 : vector<16x1xf32> to vector<16x50xf32>
    %28 = arith.addf %26, %27 : vector<16x50xf32>
    %cst_18 = arith.constant 0.000000e+00 : f32
    %29 = vector.broadcast %cst_18 : f32 to vector<16x50xf32>
    %30 = arith.maximumf %28, %29 : vector<16x50xf32>
    %31 = arith.maximumf %23, %30 : vector<16x50xf32>
    %32 = arith.maximumf %16, %31 : vector<16x50xf32>
    %33 = arith.truncf %32 : vector<16x50xf32> to vector<16x50xbf16>
    %c0_19 = arith.constant 0 : index
    %c0_20 = arith.constant 0 : index
    %34 = vector.load %arg3[%c0_19, %c0_20] : memref<16x50xbf16, #tpu.memory_space<vmem>>, vector<16x50xbf16>
    tpu.vector_store %arg3[%c0_19, %c0_20], %33 {strides = array<i32>} : memref<16x50xbf16, #tpu.memory_space<vmem>>, vector<16x50xbf16>,
    return
  }
}

module attributes {stable_mosaic.version = 11 : i64} {
  func.func @_mlp3_kernel(%arg0: memref<2x400xbf16, #tpu.memory_space<vmem>>, %arg1: memref<400x64xbf16, #tpu.memory_space<vmem>>, %arg2: memref<1x64xf32, #tpu.memory_space<vmem>>, %arg3: memref<64x32xbf16, #tpu.memory_space<vmem>>, %arg4: memref<1x32xf32, #tpu.memory_space<vmem>>, %arg5: memref<32x10xbf16, #tpu.memory_space<vmem>>, %arg6: memref<1x10xf32, #tpu.memory_space<vmem>>, %arg7: memref<2x10xf32, #tpu.memory_space<vmem>>) attributes {dimension_semantics = [], scalar_prefetch = 0 : i64, scratch_operands = 0 : i64, tpu.core_type = #tpu.core_type<tc>} {
    %c0 = arith.constant 0 : index
    %c0_0 = arith.constant 0 : index
    %0 = vector.load %arg0[%c0, %c0_0] : memref<2x400xbf16, #tpu.memory_space<vmem>>, vector<2x400xbf16>
    %c0_1 = arith.constant 0 : index
    %c0_2 = arith.constant 0 : index
    %1 = vector.load %arg1[%c0_1, %c0_2] : memref<400x64xbf16, #tpu.memory_space<vmem>>, vector<400x64xbf16>
    %cst = arith.constant dense<0.000000e+00> : vector<2x64xf32>
    %2 = tpu.matmul %0, %1, %cst {dimension_numbers = #tpu.dot_dimension_numbers<[1], [0], [0], [1], [0, 0, 1, 1], [], []>} : vector<2x400xbf16>, vector<400x64xbf16>, vector<2x64xf32> -> vector<2x64xf32>
    %c0_3 = arith.constant 0 : index
    %c0_4 = arith.constant 0 : index
    %3 = vector.load %arg2[%c0_3, %c0_4] : memref<1x64xf32, #tpu.memory_space<vmem>>, vector<1x64xf32>
    %4 = vector.broadcast %3 : vector<1x64xf32> to vector<2x64xf32>
    %5 = arith.addf %2, %4 : vector<2x64xf32>
    %cst_5 = arith.constant 0.000000e+00 : f32
    %6 = vector.broadcast %cst_5 : f32 to vector<2x64xf32>
    %7 = arith.maximumf %5, %6 : vector<2x64xf32>
    %8 = arith.truncf %7 : vector<2x64xf32> to vector<2x64xbf16>
    %c0_6 = arith.constant 0 : index
    %c0_7 = arith.constant 0 : index
    %9 = vector.load %arg3[%c0_6, %c0_7] : memref<64x32xbf16, #tpu.memory_space<vmem>>, vector<64x32xbf16>
    %cst_8 = arith.constant dense<0.000000e+00> : vector<2x32xf32>
    %10 = tpu.matmul %8, %9, %cst_8 {dimension_numbers = #tpu.dot_dimension_numbers<[1], [0], [0], [1], [0, 0, 1, 1], [], []>} : vector<2x64xbf16>, vector<64x32xbf16>, vector<2x32xf32> -> vector<2x32xf32>
    %c0_9 = arith.constant 0 : index
    %c0_10 = arith.constant 0 : index
    %11 = vector.load %arg4[%c0_9, %c0_10] : memref<1x32xf32, #tpu.memory_space<vmem>>, vector<1x32xf32>
    %12 = vector.broadcast %11 : vector<1x32xf32> to vector<2x32xf32>
    %13 = arith.addf %10, %12 : vector<2x32xf32>
    %cst_11 = arith.constant 0.000000e+00 : f32
    %14 = vector.broadcast %cst_11 : f32 to vector<2x32xf32>
    %15 = arith.maximumf %13, %14 : vector<2x32xf32>
    %16 = arith.truncf %15 : vector<2x32xf32> to vector<2x32xbf16>
    %c0_12 = arith.constant 0 : index
    %c0_13 = arith.constant 0 : index
    %17 = vector.load %arg5[%c0_12, %c0_13] : memref<32x10xbf16, #tpu.memory_space<vmem>>, vector<32x10xbf16>
    %cst_14 = arith.constant dense<0.000000e+00> : vector<2x10xf32>
    %18 = tpu.matmul %16, %17, %cst_14 {dimension_numbers = #tpu.dot_dimension_numbers<[1], [0], [0], [1], [0, 0, 1, 1], [], []>} : vector<2x32xbf16>, vector<32x10xbf16>, vector<2x10xf32> -> vector<2x10xf32>
    %c0_15 = arith.constant 0 : index
    %c0_16 = arith.constant 0 : index
    %19 = vector.load %arg6[%c0_15, %c0_16] : memref<1x10xf32, #tpu.memory_space<vmem>>, vector<1x10xf32>
    %20 = vector.broadcast %19 : vector<1x10xf32> to vector<2x10xf32>
    %21 = arith.addf %18, %20 : vector<2x10xf32>
    %cst_17 = arith.constant 0.000000e+00 : f32
    %22 = vector.broadcast %cst_17 : f32 to vector<2x10xf32>
    %23 = arith.maximumf %21, %22 : vector<2x10xf32>
    %c0_18 = arith.constant 0 : index
    %c0_19 = arith.constant 0 : index
    %24 = vector.load %arg7[%c0_18, %c0_19] : memref<2x10xf32, #tpu.memory_space<vmem>>, vector<2x10xf32>
    tpu.vector_store %arg7[%c0_18, %c0_19], %23 {strides = array<i32>} : memref<2x10xf32, #tpu.memory_space<vmem>>, vector<2x10xf32>,
    return
  }
}

</mosaic_0001>

<bundles_post_ra>
// kernel: mycnn_forward.3
= control target key start
LH: loop header
LB: loop body
LE: loop exit
PB: predicated region body
PF: predicated region fallthrough
CT: control target
= control target key end

     0   :  { %v1864_v1 = vmov 0   ;;  %vm1411_vm0 = vcmask 1043456   ;;  %vm1412_vm1 = vcmask 64516   ;;  %s2553_s0 = inlined_call_operand.vmem [shape: bf16[4,128,392], index: 0, kind: input, shape index: {}]   ;;  %s2554_s1 = inlined_call_operand.vmem [shape: bf16[32,128], index: 1, kind: input, shape index: {}]   ;;  %s2555_s2 = inlined_call_operand.vmem [shape: f32[32,1], index: 2, kind: input, shape index: {}]   ;;  %s2556_s3 = inlined_call_operand.vmem [shape: bf16[32,392], index: 3, kind: output, shape index: {}]  }
   0x1   :  { %v1670_v0 = vld [vmem:[%s2553_s0 + $0x4] ss:$16 sps:$4 sm:$0xff]   ;;  %279 = vmatprep.mubr.bf16.mxu0 %v1864_v1  ;;  %332 = vmatprep.mubr.bf16.mxu1 %v1864_v1  ;;  %v1672_v2 = vld [vmem:[%s2553_s0 + $0xc] ss:$16 sps:$4 sm:$0xff]   ;;  %v1674_v3 = vld [vmem:[%s2553_s0] ss:$16 sps:$4 sm:$0xff]  }
   0x2   :  { %1668 = vset.pattern.permute.xlu0 %v1864_v1  ;;  %1669 = vset.pattern.permute.xlu1 %v1864_v1  ;;  %v1675_v4 = vld [vmem:[%s2553_s0 + $0x8] ss:$16 sps:$4 sm:$0xff]   ;;  %v1676_v5 = vld [vmem:[%s2553_s0 + $0x24] ss:$16 sps:$4 sm:$0xff]   ;;  %v1678_v6 = vld [vmem:[%s2553_s0 + $0x2c] ss:$16 sps:$4 sm:$0xff]  }
   0x3   :  { %247 = vmatprep.subr.bf16.mxu0 %v1670_v0  ;;  %300 = vmatprep.subr.bf16.mxu1 %v1672_v2  ;;  %v1680_v7 = vld [vmem:[%s2553_s0 + $0x20] ss:$16 sps:$4 sm:$0xff]   ;;  %v1681_v8 = vld [vmem:[%s2553_s0 + $0x28] ss:$16 sps:$4 sm:$0xff]   ;;  %v1682_v9 = vld [vmem:[%s2553_s0 + $0x44] ss:$16 sps:$4 sm:$0xff]  }
   0x4   :  { %248 = vmatpush1.bf16.msra.mxu0 %v1674_v3  ;;  %301 = vmatpush1.bf16.msra.mxu1 %v1675_v4  ;;  %v1684_v10 = vld [vmem:[%s2553_s0 + $0x4c] ss:$16 sps:$4 sm:$0xff]   ;;  %v1686_v11 = vld [vmem:[%s2553_s0 + $0x40] ss:$16 sps:$4 sm:$0xff]   ;;  %v1687_v12 = vld [vmem:[%s2553_s0 + $0x48] ss:$16 sps:$4 sm:$0xff]  }
   0x5   :  { %249 = vmatprep.subr.bf16.mxu0 %v1676_v5  ;;  %302 = vmatprep.subr.bf16.mxu1 %v1678_v6  ;;  %v1688_v13 = vld [vmem:[%s2553_s0 + $0x64] ss:$16 sps:$4 sm:$0xff]   ;;  %v1690_v14 = vld [vmem:[%s2553_s0 + $0x6c] ss:$16 sps:$4 sm:$0xff]   ;;  %v1692_v15 = vld [vmem:[%s2553_s0 + $0x60] ss:$16 sps:$4 sm:$0xff]  }
   0x6   :  { %v1693_v16 = vld [vmem:[%s2553_s0 + $0x68] ss:$16 sps:$4 sm:$0xff]   ;;  %v1694_v17 = vld [vmem:[%s2553_s0 + $0x84] ss:$16 sps:$4 sm:$0xff]   ;;  %v1696_v18 = vld [vmem:[%s2553_s0 + $0x8c] ss:$16 sps:$4 sm:$0xff]  }
   0x7   :  { %v1698_v19 = vld [vmem:[%s2553_s0 + $0x80] ss:$16 sps:$4 sm:$0xff]   ;;  %v1699_v20 = vld [vmem:[%s2553_s0 + $0x88] ss:$16 sps:$4 sm:$0xff]   ;;  %v1700_v21 = vld [vmem:[%s2553_s0 + $0xa4] ss:$16 sps:$4 sm:$0xff]  }
   0x8   :  { %250 = vmatpush1.bf16.msra.mxu0 %v1680_v7  ;;  %303 = vmatpush1.bf16.msra.mxu1 %v1681_v8  ;;  %v1702_v22 = vld [vmem:[%s2553_s0 + $0xac] ss:$16 sps:$4 sm:$0xff]   ;;  %v1704_v23 = vld [vmem:[%s2553_s0 + $0xa0] ss:$16 sps:$4 sm:$0xff]   ;;  %v1705_v24 = vld [vmem:[%s2553_s0 + $0xa8] ss:$16 sps:$4 sm:$0xff]  }
   0x9   :  { %251 = vmatprep.subr.bf16.mxu0 %v1682_v9  ;;  %304 = vmatprep.subr.bf16.mxu1 %v1684_v10  ;;  %v1706_v25 = vld [vmem:[%s2553_s0 + $0xc4] ss:$16 sps:$4 sm:$0xff]   ;;  %v1708_v26 = vld [vmem:[%s2553_s0 + $0xcc] ss:$16 sps:$4 sm:$0xff]   ;;  %v1710_v27 = vld [vmem:[%s2553_s0 + $0xc0] ss:$16 sps:$4 sm:$0xff]  }
   0xa   :  { %v1711_v28 = vld [vmem:[%s2553_s0 + $0xc8] ss:$16 sps:$4 sm:$0xff]   ;;  %v1712_v29 = vld [vmem:[%s2553_s0 + $0xe4] ss:$16 sps:$4 sm:$0xff]   ;;  %v1714_v30 = vld [vmem:[%s2553_s0 + $0xec] ss:$16 sps:$4 sm:$0xff]  }
   0xb   :  { %v1716_v31 = vld [vmem:[%s2553_s0 + $0xe0] ss:$16 sps:$4 sm:$0xff]   ;;  %v1717_v32 = vld [vmem:[%s2553_s0 + $0xe8] ss:$16 sps:$4 sm:$0xff]   ;;  %v1721_v33 = vld [vmem:[%s2553_s0 + $0x104] ss:$16 sps:$4 sm:$0xff]  }
   0xc   :  { %252 = vmatpush1.bf16.msra.mxu0 %v1686_v11  ;;  %305 = vmatpush1.bf16.msra.mxu1 %v1687_v12  ;;  %v1724_v34 = vld [vmem:[%s2553_s0 + $0x10c] ss:$16 sps:$4 sm:$0xff]   ;;  %v1994_v35 = vld [vmem:[%s2554_s1] sm:$0xff]   ;;  %v1722_v37 = vld [vmem:[%s2553_s0 + $0x108] ss:$16 sps:$4 sm:$0xff]  }
   0xd   :  { %253 = vmatprep.subr.bf16.mxu0 %v1688_v13  ;;  %306 = vmatprep.subr.bf16.mxu1 %v1690_v14  ;;  %v1719_v36 = vld [vmem:[%s2553_s0 + $0x100] ss:$16 sps:$4 sm:$0xff]   ;;  %v1727_v38 = vld [vmem:[%s2553_s0 + $0x124] ss:$16 sps:$4 sm:$0xff]   ;;  %v1730_v39 = vld [vmem:[%s2553_s0 + $0x12c] ss:$16 sps:$4 sm:$0xff]  }
   0xe   :  { %v1725_v40 = vld [vmem:[%s2553_s0 + $0x120] ss:$16 sps:$4 sm:$0xff]   ;;  %v1728_v41 = vld [vmem:[%s2553_s0 + $0x128] ss:$16 sps:$4 sm:$0xff]   ;;  %v1733_v42 = vld [vmem:[%s2553_s0 + $0x144] ss:$16 sps:$4 sm:$0xff]  }
   0xf   :  { %v1736_v43 = vld [vmem:[%s2553_s0 + $0x14c] ss:$16 sps:$4 sm:$0xff]   ;;  %v1731_v45 = vld [vmem:[%s2553_s0 + $0x140] ss:$16 sps:$4 sm:$0xff]   ;;  %v1734_v46 = vld [vmem:[%s2553_s0 + $0x148] ss:$16 sps:$4 sm:$0xff]  }
  0x10   :  { %254 = vmatpush1.bf16.msra.mxu0 %v1692_v15  ;;  %307 = vmatpush1.bf16.msra.mxu1 %v1693_v16  ;;  %v2027_v44 = vld [vmem:[%s2554_s1 + $0x8] sm:$0xff]   ;;  %v1739_v47 = vld [vmem:[%s2553_s0 + $0x164] ss:$16 sps:$4 sm:$0xff]   ;;  %v1737_v49 = vld [vmem:[%s2553_s0 + $0x160] ss:$16 sps:$4 sm:$0xff]  }
  0x11   :  { %255 = vmatprep.subr.bf16.mxu0 %v1694_v17  ;;  %308 = vmatprep.subr.bf16.mxu1 %v1696_v18  ;;  %v1742_v48 = vld [vmem:[%s2553_s0 + $0x16c] ss:$16 sps:$4 sm:$0xff]   ;;  %v1740_v50 = vld [vmem:[%s2553_s0 + $0x168] ss:$16 sps:$4 sm:$0xff]   ;;  %v1745_v51 = vld [vmem:[%s2553_s0 + $0x184] ss:$16 sps:$4 sm:$0xff]  }
  0x12   :  { %v1748_v52 = vld [vmem:[%s2553_s0 + $0x18c] ss:$16 sps:$4 sm:$0xff]   ;;  %v1743_v53 = vld [vmem:[%s2553_s0 + $0x180] ss:$16 sps:$4 sm:$0xff]   ;;  %v1746_v54 = vld [vmem:[%s2553_s0 + $0x188] ss:$16 sps:$4 sm:$0xff]  }
  0x13   :  { %v1751_v55 = vld [vmem:[%s2553_s0 + $0x1a4] ss:$16 sps:$4 sm:$0xff]   ;;  %v1754_v56 = vld [vmem:[%s2553_s0 + $0x1ac] ss:$16 sps:$4 sm:$0xff]   ;;  %v1749_v57 = vld [vmem:[%s2553_s0 + $0x1a0] ss:$16 sps:$4 sm:$0xff]  }
  0x14   :  { %256 = vmatpush1.bf16.msra.mxu0 %v1698_v19  ;;  %309 = vmatpush1.bf16.msra.mxu1 %v1699_v20  ;;  %v1752_v58 = vld [vmem:[%s2553_s0 + $0x1a8] ss:$16 sps:$4 sm:$0xff]   ;;  %v1758_v59 = vld [vmem:[%s2553_s0 + $0x1c4] ss:$16 sps:$4 sm:$0xff]   ;;  %v1761_v60 = vld [vmem:[%s2553_s0 + $0x1cc] ss:$16 sps:$4 sm:$0xff]  }
  0x15   :  { %257 = vmatprep.subr.bf16.mxu0 %v1700_v21  ;;  %310 = vmatprep.subr.bf16.mxu1 %v1702_v22  ;;  %v1756_v61 = vld [vmem:[%s2553_s0 + $0x1c0] ss:$16 sps:$4 sm:$0xff]   ;;  %v1759_v62 = vld [vmem:[%s2553_s0 + $0x1c8] ss:$16 sps:$4 sm:$0xff]   ;;  %v1764_v63 = vld [vmem:[%s2553_s0 + $0x1e4] ss:$16 sps:$4 sm:$0xff]  }
  0x16   :  { %v1767_v0 = vld [vmem:[%s2553_s0 + $0x1ec] ss:$16 sps:$4 sm:$0xff]   ;;  %v1762_v2 = vld [vmem:[%s2553_s0 + $0x1e0] ss:$16 sps:$4 sm:$0xff]   ;;  %v1765_v3 = vld [vmem:[%s2553_s0 + $0x1e8] ss:$16 sps:$4 sm:$0xff]  }
  0x17   :  { %v1770_v4 = vld [vmem:[%s2553_s0 + $0x204] ss:$16 sps:$4 sm:$0xff]   ;;  %v1773_v5 = vld [vmem:[%s2553_s0 + $0x20c] ss:$16 sps:$4 sm:$0xff]   ;;  %v1768_v6 = vld [vmem:[%s2553_s0 + $0x200] ss:$16 sps:$4 sm:$0xff]  }
  0x18   :  { %258 = vmatpush1.bf16.msra.mxu0 %v1704_v23  ;;  %311 = vmatpush1.bf16.msra.mxu1 %v1705_v24  ;;  %v1771_v7 = vld [vmem:[%s2553_s0 + $0x208] ss:$16 sps:$4 sm:$0xff]   ;;  %v1776_v8 = vld [vmem:[%s2553_s0 + $0x224] ss:$16 sps:$4 sm:$0xff]   ;;  %v1779_v9 = vld [vmem:[%s2553_s0 + $0x22c] ss:$16 sps:$4 sm:$0xff]  }
  0x19   :  { %259 = vmatprep.subr.bf16.mxu0 %v1706_v25  ;;  %312 = vmatprep.subr.bf16.mxu1 %v1708_v26  ;;  %v1774_v10 = vld [vmem:[%s2553_s0 + $0x220] ss:$16 sps:$4 sm:$0xff]   ;;  %v1777_v11 = vld [vmem:[%s2553_s0 + $0x228] ss:$16 sps:$4 sm:$0xff]   ;;  %v1782_v12 = vld [vmem:[%s2553_s0 + $0x244] ss:$16 sps:$4 sm:$0xff]  }
  0x1a   :  { %v1785_v13 = vld [vmem:[%s2553_s0 + $0x24c] ss:$16 sps:$4 sm:$0xff]   ;;  %v1780_v14 = vld [vmem:[%s2553_s0 + $0x240] ss:$16 sps:$4 sm:$0xff]   ;;  %v1783_v15 = vld [vmem:[%s2553_s0 + $0x248] ss:$16 sps:$4 sm:$0xff]  }
  0x1b   :  { %v1788_v16 = vld [vmem:[%s2553_s0 + $0x264] ss:$16 sps:$4 sm:$0xff]   ;;  %v1791_v17 = vld [vmem:[%s2553_s0 + $0x26c] ss:$16 sps:$4 sm:$0xff]   ;;  %v1786_v18 = vld [vmem:[%s2553_s0 + $0x260] ss:$16 sps:$4 sm:$0xff]  }
  0x1c   :  { %260 = vmatpush1.bf16.msra.mxu0 %v1710_v27  ;;  %313 = vmatpush1.bf16.msra.mxu1 %v1711_v28  ;;  %v1789_v19 = vld [vmem:[%s2553_s0 + $0x268] ss:$16 sps:$4 sm:$0xff]   ;;  %v1794_v20 = vld [vmem:[%s2553_s0 + $0x284] ss:$16 sps:$4 sm:$0xff]   ;;  %v1797_v21 = vld [vmem:[%s2553_s0 + $0x28c] ss:$16 sps:$4 sm:$0xff]  }
  0x1d   :  { %261 = vmatprep.subr.bf16.mxu0 %v1712_v29  ;;  %314 = vmatprep.subr.bf16.mxu1 %v1714_v30  ;;  %v1792_v22 = vld [vmem:[%s2553_s0 + $0x280] ss:$16 sps:$4 sm:$0xff]   ;;  %v1795_v24 = vld [vmem:[%s2553_s0 + $0x288] ss:$16 sps:$4 sm:$0xff]   ;;  %v1800_v25 = vld [vmem:[%s2553_s0 + $0x2a4] ss:$16 sps:$4 sm:$0xff]  }
  0x1e   :  { %v19_v23 = vld [vmem:[%s2555_s2] sm:$0xff]  ;;  %v1803_v26 = vld [vmem:[%s2553_s0 + $0x2ac] ss:$16 sps:$4 sm:$0xff]   ;;  %v1801_v28 = vld [vmem:[%s2553_s0 + $0x2a8] ss:$16 sps:$4 sm:$0xff]  }
  0x1f   :  { %v1798_v27 = vld [vmem:[%s2553_s0 + $0x2a0] ss:$16 sps:$4 sm:$0xff]   ;;  %57 = vperm.xlu0 %1668, %v19_v23   ;;  %v20_v29 = vld [vmem:[%s2555_s2 + $0x8] sm:$0xff]  ;;  %v1806_v30 = vld [vmem:[%s2553_s0 + $0x2c4] ss:$16 sps:$4 sm:$0xff]  }
  0x20   :  { %262 = vmatpush1.bf16.msra.mxu0 %v1716_v31  ;;  %315 = vmatpush1.bf16.msra.mxu1 %v1717_v32  ;;  %v1809_v31 = vld [vmem:[%s2553_s0 + $0x2cc] ss:$16 sps:$4 sm:$0xff]   ;;  %v1804_v32 = vld [vmem:[%s2553_s0 + $0x2c0] ss:$16 sps:$4 sm:$0xff]   ;;  %vm2481_vm2 = vmor %vm1412_vm1, %vm1411_vm0 }
  0x21   :  { %562 = vmatprep.subr.bf16.mxu0 %v1721_v33  ;;  %615 = vmatprep.subr.bf16.mxu1 %v1724_v34  ;;  %v1807_v33 = vld [vmem:[%s2553_s0 + $0x2c8] ss:$16 sps:$4 sm:$0xff]   ;;  %v21_v34 = vld [vmem:[%s2555_s2 + $0x10] sm:$0xff] }
  0x22   :  { %67 = vperm.xlu1 %1669, %v21_v34  }
  0x23   :  { %280 = vmatmul.mubr.bf16.vlgmr.msra.gmra.mrb[0].mxu0 %v1994_v35  ;;  %333 = vmatmul.mubr.bf16.vlgmr.msra.gmra.mrb[0].mxu1 %v1994_v35 }
  0x24   :  { %563 = vmatpush1.bf16.msra.mxu0 %v1719_v36  ;;  %616 = vmatpush1.bf16.msra.mxu1 %v1722_v37  ;;  %v1812_v36 = vld [vmem:[%s2553_s0 + $0x2e4] ss:$16 sps:$4 sm:$0xff]   ;;  %v1815_v37 = vld [vmem:[%s2553_s0 + $0x2ec] ss:$16 sps:$4 sm:$0xff]  }
  0x25   :  { %564 = vmatprep.subr.bf16.mxu0 %v1727_v38  ;;  %617 = vmatprep.subr.bf16.mxu1 %v1730_v39  ;;  %v22_v38 = vld [vmem:[%s2555_s2 + $0x18] sm:$0xff]  ;;  %v1810_v39 = vld [vmem:[%s2553_s0 + $0x2e0] ss:$16 sps:$4 sm:$0xff]  }
  0x26   :  { %289 = vmatprep.mubr.bf16.mxu0 %v1864_v1  ;;  %342 = vmatprep.mubr.bf16.mxu1 %v1864_v1 }
  0x27   :  { %62 = vperm.xlu0 %1668, %v20_v29   ;;  %72 = vperm.xlu1 %1669, %v22_v38  }
  0x28   :  { %565 = vmatpush1.bf16.msra.mxu0 %v1725_v40  ;;  %618 = vmatpush1.bf16.msra.mxu1 %v1728_v41  ;;  %v1813_v40 = vld [vmem:[%s2553_s0 + $0x2e8] ss:$16 sps:$4 sm:$0xff]   ;;  %v1818_v41 = vld [vmem:[%s2553_s0 + $0x304] ss:$16 sps:$4 sm:$0xff]  }
  0x29   :  { %566 = vmatprep.subr.bf16.mxu0 %v1733_v42  ;;  %619 = vmatprep.subr.bf16.mxu1 %v1736_v43  ;;  %v1821_v42 = vld [vmem:[%s2553_s0 + $0x30c] ss:$16 sps:$4 sm:$0xff]   ;;  %v1816_v43 = vld [vmem:[%s2553_s0 + $0x300] ss:$16 sps:$4 sm:$0xff]  }
  0x2b   :  { %290 = vmatmul.mubr.bf16.gmra.mrb[4].mxu0 %v2027_v44  ;;  %343 = vmatmul.mubr.bf16.gmra.mrb[4].mxu1 %v2027_v44 }
  0x2c   :  { %567 = vmatpush1.bf16.msra.mxu0 %v1731_v45  ;;  %620 = vmatpush1.bf16.msra.mxu1 %v1734_v46  ;;  %v1819_v45 = vld [vmem:[%s2553_s0 + $0x308] ss:$16 sps:$4 sm:$0xff]   ;;  %v1824_v46 = vld [vmem:[%s2553_s0 + $0x324] ss:$16 sps:$4 sm:$0xff]  }
  0x2d   :  { %568 = vmatprep.subr.bf16.mxu0 %v1739_v47  ;;  %621 = vmatprep.subr.bf16.mxu1 %v1742_v48  ;;  %v1827_v47 = vld [vmem:[%s2553_s0 + $0x32c] ss:$16 sps:$4 sm:$0xff]   ;;  %v1822_v48 = vld [vmem:[%s2553_s0 + $0x320] ss:$16 sps:$4 sm:$0xff]  }
  0x2e   :  { %594 = vmatprep.mubr.bf16.mxu0 %v1864_v1  ;;  %647 = vmatprep.mubr.bf16.mxu1 %v1864_v1 }
  0x30   :  { %569 = vmatpush1.bf16.msra.mxu0 %v1737_v49  ;;  %622 = vmatpush1.bf16.msra.mxu1 %v1740_v50  ;;  %v1825_v49 = vld [vmem:[%s2553_s0 + $0x328] ss:$16 sps:$4 sm:$0xff]   ;;  %v1830_v50 = vld [vmem:[%s2553_s0 + $0x344] ss:$16 sps:$4 sm:$0xff]  }
  0x31   :  { %570 = vmatprep.subr.bf16.mxu0 %v1745_v51  ;;  %623 = vmatprep.subr.bf16.mxu1 %v1748_v52  ;;  %v1833_v51 = vld [vmem:[%s2553_s0 + $0x34c] ss:$16 sps:$4 sm:$0xff]   ;;  %v1828_v52 = vld [vmem:[%s2553_s0 + $0x340] ss:$16 sps:$4 sm:$0xff]  }
  0x34   :  { %571 = vmatpush1.bf16.msra.mxu0 %v1743_v53  ;;  %624 = vmatpush1.bf16.msra.mxu1 %v1746_v54  ;;  %v1831_v53 = vld [vmem:[%s2553_s0 + $0x348] ss:$16 sps:$4 sm:$0xff]   ;;  %v1836_v54 = vld [vmem:[%s2553_s0 + $0x364] ss:$16 sps:$4 sm:$0xff]  }
  0x35   :  { %572 = vmatprep.subr.bf16.mxu0 %v1751_v55  ;;  %625 = vmatprep.subr.bf16.mxu1 %v1754_v56  ;;  %v1839_v55 = vld [vmem:[%s2553_s0 + $0x36c] ss:$16 sps:$4 sm:$0xff]   ;;  %v1834_v56 = vld [vmem:[%s2553_s0 + $0x360] ss:$16 sps:$4 sm:$0xff]  }
  0x38   :  { %573 = vmatpush1.bf16.msra.mxu0 %v1749_v57  ;;  %626 = vmatpush1.bf16.msra.mxu1 %v1752_v58  ;;  %v1837_v57 = vld [vmem:[%s2553_s0 + $0x368] ss:$16 sps:$4 sm:$0xff]   ;;  %v1842_v58 = vld [vmem:[%s2553_s0 + $0x384] ss:$16 sps:$4 sm:$0xff]  }
  0x39   :  { %574 = vmatprep.subr.bf16.mxu0 %v1758_v59  ;;  %627 = vmatprep.subr.bf16.mxu1 %v1761_v60  ;;  %v1845_v59 = vld [vmem:[%s2553_s0 + $0x38c] ss:$16 sps:$4 sm:$0xff]   ;;  %v1840_v60 = vld [vmem:[%s2553_s0 + $0x380] ss:$16 sps:$4 sm:$0xff]  }
  0x3c   :  { %575 = vmatpush1.bf16.msra.mxu0 %v1756_v61  ;;  %628 = vmatpush1.bf16.msra.mxu1 %v1759_v62  ;;  %v1843_v61 = vld [vmem:[%s2553_s0 + $0x388] ss:$16 sps:$4 sm:$0xff]   ;;  %v1848_v62 = vld [vmem:[%s2553_s0 + $0x3a4] ss:$16 sps:$4 sm:$0xff]  }
  0x3d   :  { %576 = vmatprep.subr.bf16.mxu0 %v1764_v63  ;;  %629 = vmatprep.subr.bf16.mxu1 %v1767_v0  ;;  %v1851_v63 = vld [vmem:[%s2553_s0 + $0x3ac] ss:$16 sps:$4 sm:$0xff]   ;;  %v1846_v0 = vld [vmem:[%s2553_s0 + $0x3a0] ss:$16 sps:$4 sm:$0xff]  }
  0x40   :  { %577 = vmatpush1.bf16.msra.mxu0 %v1762_v2  ;;  %630 = vmatpush1.bf16.msra.mxu1 %v1765_v3  ;;  %v1849_v2 = vld [vmem:[%s2553_s0 + $0x3a8] ss:$16 sps:$4 sm:$0xff]   ;;  %v1854_v3 = vld [vmem:[%s2553_s0 + $0x3c4] ss:$16 sps:$4 sm:$0xff]  }
  0x41   :  { %893 = vmatprep.subr.bf16.mxu0 %v1770_v4  ;;  %946 = vmatprep.subr.bf16.mxu1 %v1773_v5  ;;  %v1857_v4 = vld [vmem:[%s2553_s0 + $0x3cc] ss:$16 sps:$4 sm:$0xff]   ;;  %v1852_v5 = vld [vmem:[%s2553_s0 + $0x3c0] ss:$16 sps:$4 sm:$0xff]  }
  0x43   :  { %595 = vmatmul.mubr.bf16.vlgmr.msra.gmra.mrb[8].mxu0 %v1994_v35  ;;  %648 = vmatmul.mubr.bf16.vlgmr.msra.gmra.mrb[8].mxu1 %v1994_v35 }
  0x44   :  { %894 = vmatpush1.bf16.msra.mxu0 %v1768_v6  ;;  %947 = vmatpush1.bf16.msra.mxu1 %v1771_v7  ;;  %v1855_v6 = vld [vmem:[%s2553_s0 + $0x3c8] ss:$16 sps:$4 sm:$0xff]   ;;  %v1860_v7 = vld [vmem:[%s2553_s0 + $0x3e4] ss:$16 sps:$4 sm:$0xff]  }
  0x45   :  { %895 = vmatprep.subr.bf16.mxu0 %v1776_v8  ;;  %948 = vmatprep.subr.bf16.mxu1 %v1779_v9  ;;  %v1863_v8 = vld [vmem:[%s2553_s0 + $0x3ec] ss:$16 sps:$4 sm:$0xff]   ;;  %v1858_v9 = vld [vmem:[%s2553_s0 + $0x3e0] ss:$16 sps:$4 sm:$0xff]  }
  0x46   :  { %604 = vmatprep.mubr.bf16.mxu0 %v1864_v1  ;;  %657 = vmatprep.mubr.bf16.mxu1 %v1864_v1 }
  0x48   :  { %896 = vmatpush1.bf16.msra.mxu0 %v1774_v10  ;;  %949 = vmatpush1.bf16.msra.mxu1 %v1777_v11  ;;  %v1861_v10 = vld [vmem:[%s2553_s0 + $0x3e8] ss:$16 sps:$4 sm:$0xff]  }
  0x49   :  { %897 = vmatprep.subr.bf16.mxu0 %v1782_v12  ;;  %950 = vmatprep.subr.bf16.mxu1 %v1785_v13 }
  0x4b   :  { %605 = vmatmul.mubr.bf16.gmra.mrb[12].mxu0 %v2027_v44  ;;  %658 = vmatmul.mubr.bf16.gmra.mrb[12].mxu1 %v2027_v44 }
  0x4c   :  { %898 = vmatpush1.bf16.msra.mxu0 %v1780_v14  ;;  %951 = vmatpush1.bf16.msra.mxu1 %v1783_v15 }
  0x4d   :  { %899 = vmatprep.subr.bf16.mxu0 %v1788_v16  ;;  %952 = vmatprep.subr.bf16.mxu1 %v1791_v17 }
  0x4e   :  { %925 = vmatprep.mubr.bf16.mxu0 %v1864_v1  ;;  %978 = vmatprep.mubr.bf16.mxu1 %v1864_v1 }
  0x50   :  { %900 = vmatpush1.bf16.msra.mxu0 %v1786_v18  ;;  %953 = vmatpush1.bf16.msra.mxu1 %v1789_v19 }
  0x51   :  { %901 = vmatprep.subr.bf16.mxu0 %v1794_v20  ;;  %954 = vmatprep.subr.bf16.mxu1 %v1797_v21 }
  0x54   :  { %902 = vmatpush1.bf16.msra.mxu0 %v1792_v22  ;;  %955 = vmatpush1.bf16.msra.mxu1 %v1795_v24 }
  0x55   :  { %903 = vmatprep.subr.bf16.mxu0 %v1800_v25  ;;  %956 = vmatprep.subr.bf16.mxu1 %v1803_v26 }
  0x58   :  { %904 = vmatpush1.bf16.msra.mxu0 %v1798_v27  ;;  %957 = vmatpush1.bf16.msra.mxu1 %v1801_v28 }
  0x59   :  { %905 = vmatprep.subr.bf16.mxu0 %v1806_v30  ;;  %958 = vmatprep.subr.bf16.mxu1 %v1809_v31 }
  0x5c   :  { %906 = vmatpush1.bf16.msra.mxu0 %v1804_v32  ;;  %959 = vmatpush1.bf16.msra.mxu1 %v1807_v33 }
  0x5d   :  { %907 = vmatprep.subr.bf16.mxu0 %v1812_v36  ;;  %960 = vmatprep.subr.bf16.mxu1 %v1815_v37 }
  0x60   :  { %908 = vmatpush1.bf16.msra.mxu0 %v1810_v39  ;;  %961 = vmatpush1.bf16.msra.mxu1 %v1813_v40 }
  0x61   :  { %1208 = vmatprep.subr.bf16.mxu0 %v1818_v41  ;;  %1261 = vmatprep.subr.bf16.mxu1 %v1821_v42 }
  0x63   :  { %926 = vmatmul.mubr.bf16.vlgmr.msra.gmra.mrb[16].mxu0 %v1994_v35  ;;  %979 = vmatmul.mubr.bf16.vlgmr.msra.gmra.mrb[16].mxu1 %v1994_v35 }
  0x64   :  { %1209 = vmatpush1.bf16.msra.mxu0 %v1816_v43  ;;  %1262 = vmatpush1.bf16.msra.mxu1 %v1819_v45 }
  0x65   :  { %1210 = vmatprep.subr.bf16.mxu0 %v1824_v46  ;;  %1263 = vmatprep.subr.bf16.mxu1 %v1827_v47 }
  0x66   :  { %935 = vmatprep.mubr.bf16.mxu0 %v1864_v1  ;;  %988 = vmatprep.mubr.bf16.mxu1 %v1864_v1 }
  0x68   :  { %1211 = vmatpush1.bf16.msra.mxu0 %v1822_v48  ;;  %1264 = vmatpush1.bf16.msra.mxu1 %v1825_v49 }
  0x69   :  { %1212 = vmatprep.subr.bf16.mxu0 %v1830_v50  ;;  %1265 = vmatprep.subr.bf16.mxu1 %v1833_v51 }
  0x6b   :  { %936 = vmatmul.mubr.bf16.gmra.mrb[20].mxu0 %v2027_v44  ;;  %989 = vmatmul.mubr.bf16.gmra.mrb[20].mxu1 %v2027_v44 }
  0x6c   :  { %1213 = vmatpush1.bf16.msra.mxu0 %v1828_v52  ;;  %1266 = vmatpush1.bf16.msra.mxu1 %v1831_v53 }
  0x6d   :  { %1214 = vmatprep.subr.bf16.mxu0 %v1836_v54  ;;  %1267 = vmatprep.subr.bf16.mxu1 %v1839_v55 }
  0x6e   :  { %1240 = vmatprep.mubr.bf16.mxu0 %v1864_v1  ;;  %1293 = vmatprep.mubr.bf16.mxu1 %v1864_v1 }
  0x70   :  { %1215 = vmatpush1.bf16.msra.mxu0 %v1834_v56  ;;  %1268 = vmatpush1.bf16.msra.mxu1 %v1837_v57 }
  0x71   :  { %1216 = vmatprep.subr.bf16.mxu0 %v1842_v58  ;;  %1269 = vmatprep.subr.bf16.mxu1 %v1845_v59 }
  0x74   :  { %1217 = vmatpush1.bf16.msra.mxu0 %v1840_v60  ;;  %1270 = vmatpush1.bf16.msra.mxu1 %v1843_v61 }
  0x75   :  { %1218 = vmatprep.subr.bf16.mxu0 %v1848_v62  ;;  %1271 = vmatprep.subr.bf16.mxu1 %v1851_v63 }
  0x78   :  { %1219 = vmatpush1.bf16.msra.mxu0 %v1846_v0  ;;  %1272 = vmatpush1.bf16.msra.mxu1 %v1849_v2 }
  0x79   :  { %1220 = vmatprep.subr.bf16.mxu0 %v1854_v3  ;;  %1273 = vmatprep.subr.bf16.mxu1 %v1857_v4 }
  0x7c   :  { %1221 = vmatpush1.bf16.msra.mxu0 %v1852_v5  ;;  %1274 = vmatpush1.bf16.msra.mxu1 %v1855_v6 }
  0x7d   :  { %1222 = vmatprep.subr.bf16.mxu0 %v1860_v7  ;;  %1275 = vmatprep.subr.bf16.mxu1 %v1863_v8 }
  0x80   :  { %1223 = vmatpush1.bf16.msra.mxu0 %v1858_v9  ;;  %1276 = vmatpush1.bf16.msra.mxu1 %v1861_v10 }
  0x83   :  { %1241 = vmatmul.mubr.bf16.vlgmr.msra.gmra.mrb[24].mxu0 %v1994_v35  ;;  %1294 = vmatmul.mubr.bf16.vlgmr.msra.gmra.mrb[24].mxu1 %v1994_v35 }
  0x84   :  { %1250 = vmatprep.mubr.bf16.mxu0 %v1864_v1  ;;  %1303 = vmatprep.mubr.bf16.mxu1 %v1864_v1 }
  0x8b   :  { %1251 = vmatmul.mubr.bf16.gmra.mrb[28].mxu0 %v2027_v44  ;;  %1304 = vmatmul.mubr.bf16.gmra.mrb[28].mxu1 %v2027_v44 }
  0x9e   :  { %v2325_v25 = vpop.permute.xlu0 %57 }
  0xa1   :  { %v2329_v44 = vpop.permute.xlu1 %67 }
  0xa6   :  { %v2327_v26 = vpop.permute.xlu0 %62  ;;  %v2339_v40 = vpop.permute.xlu1 %72 }
  0xf6   :  { %v281_v11 = vpop.f32.mrb[0].mxu0  ;;  %v334_v12 = vpop.f32.mrb[0].mxu1 }
  0xf7   :  { %v283_v13 = vpop.f32.mrb[1].mxu0  ;;  %v336_v14 = vpop.f32.mrb[1].mxu1  ;;  %v282_v27 = vadd.f32 %v281_v11, %v2325_v25  ;;  %v335_v28 = vadd.f32 %v334_v12, %v2325_v25 }
  0xf8   :  { %v285_v15 = vpop.f32.mrb[2].mxu0  ;;  %v338_v16 = vpop.f32.mrb[2].mxu1  ;;  %v284_v29 = vadd.f32 %v283_v13, %v2325_v25  ;;  %v337_v30 = vadd.f32 %v336_v14, %v2325_v25 }
  0xf9   :  { %v287_v17 = vpop.f32.mrb[3].mxu0  ;;  %v340_v18 = vpop.f32.mrb[3].mxu1  ;;  %v286_v31 = vadd.f32 %v285_v15, %v2327_v26  ;;  %v339_v32 = vadd.f32 %v338_v16, %v2327_v26  ;;  %v353_v36 = vmax.f32 %v282_v27, 0.0  ;;  %v355_v37 = vmax.f32 %v335_v28, 0.0 }
  0xfa   :  { %v288_v33 = vadd.f32 %v287_v17, %v2327_v26  ;;  %v341_v34 = vadd.f32 %v340_v18, %v2327_v26  ;;  %v354_v38 = vmax.f32 %v284_v29, 0.0  ;;  %v356_v39 = vmax.f32 %v337_v30, 0.0 }
  0xfb   :  { %v357_v41 = vmax.f32 %v286_v31, 0.0  ;;  %v359_v42 = vmax.f32 %v339_v32, 0.0 }
  0xfc   :  { %v358_v43 = vmax.f32 %v288_v33, 0.0  ;;  %v360_v45 = vmax.f32 %v341_v34, 0.0 }
  0xfe   :  { %v291_v19 = vpop.f32.mrb[4].mxu0  ;;  %v344_v20 = vpop.f32.mrb[4].mxu1 }
  0xff   :  { %v293_v21 = vpop.f32.mrb[5].mxu0  ;;  %v346_v35 = vpop.f32.mrb[5].mxu1  ;;  %v2342_v46 = vadd.f32 %v291_v19, %v2329_v44  ;;  %v2345_v47 = vadd.f32 %v344_v20, %v2329_v44 }
 0x100   :  { %v295_v22 = vpop.f32.mrb[6].mxu0  ;;  %v348_v23 = vpop.f32.mrb[6].mxu1  ;;  %v2348_v48 = vadd.f32 %v293_v21, %v2329_v44  ;;  %v2351_v49 = vadd.f32 %v346_v35, %v2329_v44 }
 0x101   :  { %v297_v24 = vpop.f32.mrb[7].mxu0  ;;  %v350_v1 = vpop.f32.mrb[7].mxu1  ;;  %v2356_v56 = vadd.f32 %v295_v22, %v2339_v40  ;;  %v2359_v57 = vadd.f32 %v348_v23, %v2339_v40  ;;  %v361_v19 = vmax.f32 %v2342_v46, 0.0  ;;  %v363_v20 = vmax.f32 %v2345_v47, 0.0 }
 0x102   :  { %v2362_v58 = vadd.f32 %v297_v24, %v2339_v40  ;;  %v2365_v59 = vadd.f32 %v350_v1, %v2339_v40  ;;  %v362_v22 = vmax.f32 %v2348_v48, 0.0  ;;  %v364_v23 = vmax.f32 %v2351_v49, 0.0 }
 0x103   :  { %v365_v33 = vmax.f32 %v2356_v56, 0.0  ;;  %v367_v34 = vmax.f32 %v2359_v57, 0.0 }
 0x116   :  { %v596_v50 = vpop.f32.mrb[8].mxu0  ;;  %v649_v51 = vpop.f32.mrb[8].mxu1 }
 0x117   :  { %v597_v52 = vadd.f32 %v596_v50, %v2325_v25  ;;  %v650_v53 = vadd.f32 %v649_v51, %v2325_v25  ;;  %v598_v54 = vpop.f32.mrb[9].mxu0  ;;  %v651_v55 = vpop.f32.mrb[9].mxu1 }
 0x118   :  { %v599_v60 = vadd.f32 %v598_v54, %v2325_v25  ;;  %v652_v61 = vadd.f32 %v651_v55, %v2325_v25  ;;  %v600_v62 = vpop.f32.mrb[10].mxu0  ;;  %v653_v63 = vpop.f32.mrb[10].mxu1 }
 0x119   :  { %v668_v0 = vmax.f32 %v597_v52, 0.0  ;;  %v670_v2 = vmax.f32 %v650_v53, 0.0  ;;  %v601_v3 = vadd.f32 %v600_v62, %v2327_v26  ;;  %v654_v4 = vadd.f32 %v653_v63, %v2327_v26  ;;  %v602_v5 = vpop.f32.mrb[11].mxu0  ;;  %v655_v6 = vpop.f32.mrb[11].mxu1 }
 0x11a   :  { %v669_v7 = vmax.f32 %v599_v60, 0.0  ;;  %v671_v8 = vmax.f32 %v652_v61, 0.0  ;;  %v603_v9 = vadd.f32 %v602_v5, %v2327_v26  ;;  %v656_v10 = vadd.f32 %v655_v6, %v2327_v26 }
 0x11b   :  { %v2373_v11 = vmax.f32 %v353_v36, %v668_v0  ;;  %v2375_v12 = vmax.f32 %v355_v37, %v670_v2  ;;  %v672_v13 = vmax.f32 %v601_v3, 0.0  ;;  %v674_v14 = vmax.f32 %v654_v4, 0.0 }
 0x11c   :  { %v2377_v15 = vmax.f32 %v354_v38, %v669_v7  ;;  %v2379_v16 = vmax.f32 %v356_v39, %v671_v8  ;;  %v673_v17 = vmax.f32 %v603_v9, 0.0  ;;  %v675_v18 = vmax.f32 %v656_v10, 0.0 }
 0x11d   :  { %v2383_v21 = vmax.f32 %v357_v41, %v672_v13  ;;  %v2385_v35 = vmax.f32 %v359_v42, %v674_v14  ;;  %v366_v36 = vmax.f32 %v2362_v58, 0.0  ;;  %v368_v37 = vmax.f32 %v2365_v59, 0.0 }
 0x11e   :  { %v2389_v24 = vmax.f32 %v358_v43, %v673_v17  ;;  %v2391_v1 = vmax.f32 %v360_v45, %v675_v18  ;;  %v606_v27 = vpop.f32.mrb[12].mxu0  ;;  %v659_v28 = vpop.f32.mrb[12].mxu1 }
 0x11f   :  { %v607_v29 = vadd.f32 %v606_v27, %v2329_v44  ;;  %v660_v30 = vadd.f32 %v659_v28, %v2329_v44  ;;  %v608_v31 = vpop.f32.mrb[13].mxu0  ;;  %v661_v32 = vpop.f32.mrb[13].mxu1 }
 0x120   :  { %v609_v38 = vadd.f32 %v608_v31, %v2329_v44  ;;  %v662_v39 = vadd.f32 %v661_v32, %v2329_v44  ;;  %v610_v41 = vpop.f32.mrb[14].mxu0  ;;  %v663_v42 = vpop.f32.mrb[14].mxu1 }
 0x121   :  { %v676_v43 = vmax.f32 %v607_v29, 0.0  ;;  %v678_v45 = vmax.f32 %v660_v30, 0.0  ;;  %v611_v46 = vadd.f32 %v610_v41, %v2339_v40  ;;  %v664_v47 = vadd.f32 %v663_v42, %v2339_v40  ;;  %v612_v48 = vpop.f32.mrb[15].mxu0  ;;  %v665_v49 = vpop.f32.mrb[15].mxu1 }
 0x122   :  { %v677_v50 = vmax.f32 %v609_v38, 0.0  ;;  %v679_v51 = vmax.f32 %v662_v39, 0.0  ;;  %v613_v52 = vadd.f32 %v612_v48, %v2339_v40  ;;  %v666_v53 = vadd.f32 %v665_v49, %v2339_v40 }
 0x123   :  { %v2405_v54 = vmax.f32 %v361_v19, %v676_v43  ;;  %v2407_v55 = vmax.f32 %v363_v20, %v678_v45  ;;  %v680_v56 = vmax.f32 %v611_v46, 0.0  ;;  %v682_v57 = vmax.f32 %v664_v47, 0.0 }
 0x124   :  { %v2409_v58 = vmax.f32 %v362_v22, %v677_v50  ;;  %v2411_v59 = vmax.f32 %v364_v23, %v679_v51  ;;  %v681_v60 = vmax.f32 %v613_v52, 0.0  ;;  %v683_v61 = vmax.f32 %v666_v53, 0.0 }
 0x125   :  { %v2413_v62 = vmax.f32 %v365_v33, %v680_v56  ;;  %v2415_v63 = vmax.f32 %v367_v34, %v682_v57 }
 0x126   :  { %v2417_v0 = vmax.f32 %v366_v36, %v681_v60  ;;  %v2419_v2 = vmax.f32 %v368_v37, %v683_v61 }
 0x136   :  { %v927_v3 = vpop.f32.mrb[16].mxu0  ;;  %v980_v4 = vpop.f32.mrb[16].mxu1 }
 0x137   :  { %v929_v5 = vpop.f32.mrb[17].mxu0  ;;  %v982_v6 = vpop.f32.mrb[17].mxu1  ;;  %v928_v27 = vadd.f32 %v927_v3, %v2325_v25  ;;  %v981_v28 = vadd.f32 %v980_v4, %v2325_v25 }
 0x138   :  { %v931_v7 = vpop.f32.mrb[18].mxu0  ;;  %v984_v8 = vpop.f32.mrb[18].mxu1  ;;  %v930_v29 = vadd.f32 %v929_v5, %v2325_v25  ;;  %v983_v30 = vadd.f32 %v982_v6, %v2325_v25 }
 0x139   :  { %v933_v9 = vpop.f32.mrb[19].mxu0  ;;  %v986_v10 = vpop.f32.mrb[19].mxu1  ;;  %v932_v31 = vadd.f32 %v931_v7, %v2327_v26  ;;  %v985_v32 = vadd.f32 %v984_v8, %v2327_v26  ;;  %v999_v41 = vmax.f32 %v928_v27, 0.0  ;;  %v1001_v42 = vmax.f32 %v981_v28, 0.0 }
 0x13a   :  { %v2428_v33 = vadd.f32 %v933_v9, %v2327_v26  ;;  %v2431_v34 = vadd.f32 %v986_v10, %v2327_v26  ;;  %v1000_v46 = vmax.f32 %v930_v29, 0.0  ;;  %v1002_v47 = vmax.f32 %v983_v30, 0.0 }
 0x13b   :  { %v1003_v50 = vmax.f32 %v932_v31, 0.0  ;;  %v1005_v51 = vmax.f32 %v985_v32, 0.0 }
 0x13c   :  { %v1004_v52 = vmax.f32 %v2428_v33, 0.0  ;;  %v1006_v53 = vmax.f32 %v2431_v34, 0.0 }
 0x13e   :  { %v937_v13 = vpop.f32.mrb[20].mxu0  ;;  %v990_v14 = vpop.f32.mrb[20].mxu1 }
 0x13f   :  { %v939_v17 = vpop.f32.mrb[21].mxu0  ;;  %v992_v18 = vpop.f32.mrb[21].mxu1  ;;  %v2434_v36 = vadd.f32 %v937_v13, %v2329_v44  ;;  %v2437_v37 = vadd.f32 %v990_v14, %v2329_v44 }
 0x140   :  { %v941_v19 = vpop.f32.mrb[22].mxu0  ;;  %v994_v20 = vpop.f32.mrb[22].mxu1  ;;  %v2440_v38 = vadd.f32 %v939_v17, %v2329_v44  ;;  %v2443_v39 = vadd.f32 %v992_v18, %v2329_v44 }
 0x141   :  { %v943_v22 = vpop.f32.mrb[23].mxu0  ;;  %v996_v23 = vpop.f32.mrb[23].mxu1  ;;  %v2446_v43 = vadd.f32 %v941_v19, %v2339_v40  ;;  %v2449_v45 = vadd.f32 %v994_v20, %v2339_v40  ;;  %v1007_v56 = vmax.f32 %v2434_v36, 0.0  ;;  %v1009_v57 = vmax.f32 %v2437_v37, 0.0 }
 0x142   :  { %v2452_v48 = vadd.f32 %v943_v22, %v2339_v40  ;;  %v2455_v49 = vadd.f32 %v996_v23, %v2339_v40  ;;  %v1008_v60 = vmax.f32 %v2440_v38, 0.0  ;;  %v1010_v61 = vmax.f32 %v2443_v39, 0.0 }
 0x143   :  { %v1011_v5 = vmax.f32 %v2446_v43, 0.0 }
 0x156   :  { %v1242_v3 = vpop.f32.mrb[24].mxu0  ;;  %v1295_v4 = vpop.f32.mrb[24].mxu1 }
 0x157   :  { %v1243_v7 = vadd.f32 %v1242_v3, %v2325_v25  ;;  %v1296_v8 = vadd.f32 %v1295_v4, %v2325_v25  ;;  %v1244_v9 = vpop.f32.mrb[25].mxu0  ;;  %v1297_v10 = vpop.f32.mrb[25].mxu1 }
 0x158   :  { %v1245_v17 = vadd.f32 %v1244_v9, %v2325_v25  ;;  %v1298_v18 = vadd.f32 %v1297_v10, %v2325_v25  ;;  %v1246_v19 = vpop.f32.mrb[26].mxu0  ;;  %v1299_v20 = vpop.f32.mrb[26].mxu1 }
 0x159   :  { %v1314_v22 = vmax.f32 %v1243_v7, 0.0  ;;  %v1316_v23 = vmax.f32 %v1296_v8, 0.0  ;;  %v1247_v27 = vadd.f32 %v1246_v19, %v2327_v26  ;;  %v1300_v28 = vadd.f32 %v1299_v20, %v2327_v26  ;;  %v1248_v29 = vpop.f32.mrb[27].mxu0  ;;  %v1301_v30 = vpop.f32.mrb[27].mxu1 }
 0x15a   :  { %v1315_v31 = vmax.f32 %v1245_v17, 0.0  ;;  %v1317_v32 = vmax.f32 %v1298_v18, 0.0  ;;  %v1249_v33 = vadd.f32 %v1248_v29, %v2327_v26  ;;  %v1302_v34 = vadd.f32 %v1301_v30, %v2327_v26 }
 0x15b   :  { %v1330_v3 = vmax.f32 %v999_v41, %v1314_v22  ;;  %v1332_v4 = vmax.f32 %v1001_v42, %v1316_v23  ;;  %v1318_v9 = vmax.f32 %v1247_v27, 0.0  ;;  %v1320_v25 = vmax.f32 %v1300_v28, 0.0 }
 0x15c   :  { %v1331_v10 = vmax.f32 %v1000_v46, %v1315_v31  ;;  %v1333_v14 = vmax.f32 %v1002_v47, %v1317_v32  ;;  %v1319_v7 = vmax.f32 %v1249_v33, 0.0  ;;  %v1321_v8 = vmax.f32 %v1302_v34, 0.0 }
 0x15d   :  { %v1346_v19 = vmax.f32 %v2373_v11, %v1330_v3  ;;  %v1348_v20 = vmax.f32 %v2375_v12, %v1332_v4  ;;  %v1334_v13 = vmax.f32 %v1003_v50, %v1318_v9  ;;  %v1336_v6 = vmax.f32 %v1005_v51, %v1320_v25 }
 0x15e   :  { %v1347_v17 = vmax.f32 %v2377_v15, %v1331_v10  ;;  %v1349_v18 = vmax.f32 %v2379_v16, %v1333_v14  ;;  %v1335_v29 = vmax.f32 %v1004_v52, %v1319_v7  ;;  %v1337_v26 = vmax.f32 %v1006_v53, %v1321_v8  ;;  %v1252_v41 = vpop.f32.mrb[28].mxu0  ;;  %v1305_v42 = vpop.f32.mrb[28].mxu1 }
 0x15f   :  { %v1350_v11 = vmax.f32 %v2383_v21, %v1334_v13  ;;  %v1352_v12 = vmax.f32 %v2385_v35, %v1336_v6  ;;  %v1253_v47 = vadd.f32 %v1252_v41, %v2329_v44  ;;  %v1306_v15 = vadd.f32 %v1305_v42, %v2329_v44  ;;  %v1254_v50 = vpop.f32.mrb[29].mxu0  ;;  %v1307_v16 = vpop.f32.mrb[29].mxu1 }
 0x160   :  { %v1659_v51 = vpack.c.bf16 %v1347_v17, %v1346_v19  ;;  %v1660_v52 = vpack.c.bf16 %v1349_v18, %v1348_v20  ;;  %v1351_v53 = vmax.f32 %v2389_v24, %v1335_v29  ;;  %v1353_v14 = vmax.f32 %v2391_v1, %v1337_v26  ;;  %v1256_v22 = vpop.f32.mrb[30].mxu0  ;;  %v1309_v23 = vpop.f32.mrb[30].mxu1 }
 0x161   :  { %v1322_v27 = vmax.f32 %v1253_v47, 0.0  ;;  %v1324_v28 = vmax.f32 %v1306_v15, 0.0  ;;  %v1255_v21 = vadd.f32 %v1254_v50, %v2329_v44  ;;  %v1308_v35 = vadd.f32 %v1307_v16, %v2329_v44  ;;  %v1258_v6 = vpop.f32.mrb[31].mxu0  ;;  %v1311_v13 = vpop.f32.mrb[31].mxu1 }
 0x162   :  { %1410 = vst [vmem:[%s2556_s3] sm:$0xff] %v1659_v51  ;;  %1414 = vst.msk [vmem:[%s2556_s3 + $0x8] sm:$0xff] %vm2481_vm2, %v1660_v52  ;;  %v1661_v24 = vpack.c.bf16 %v1351_v53, %v1350_v11  ;;  %v1662_v1 = vpack.c.bf16 %v1353_v14, %v1352_v12  ;;  %v1257_v30 = vadd.f32 %v1256_v22, %v2339_v40  ;;  %v2559_v7 = vmax.f32 %v2449_v45, 0.0 }
 0x163   :  { %v1310_v31 = vadd.f32 %v1309_v23, %v2339_v40  ;;  %v1338_v44 = vmax.f32 %v1007_v56, %v1322_v27  ;;  %v1340_v32 = vmax.f32 %v1009_v57, %v1324_v28  ;;  %v1323_v33 = vmax.f32 %v1255_v21, 0.0 }
 0x164   :  { %v1325_v34 = vmax.f32 %v1308_v35, 0.0  ;;  %1415 = vst [vmem:[%s2556_s3 + $0x10] sm:$0xff] %v1661_v24  ;;  %1416 = vst.msk [vmem:[%s2556_s3 + $0x18] sm:$0xff] %vm2481_vm2, %v1662_v1  ;;  %v1326_v3 = vmax.f32 %v1257_v30, 0.0  ;;  %v1259_v36 = vadd.f32 %v1258_v6, %v2339_v40  ;;  %v1312_v56 = vadd.f32 %v1311_v13, %v2339_v40 }
 0x165   :  { %v1328_v4 = vmax.f32 %v1310_v31, 0.0  ;;  %v1354_v37 = vmax.f32 %v2405_v54, %v1338_v44  ;;  %v1356_v57 = vmax.f32 %v2407_v55, %v1340_v32  ;;  %v1339_v9 = vmax.f32 %v1008_v60, %v1323_v33 }
 0x166   :  { %v1341_v25 = vmax.f32 %v1010_v61, %v1325_v34  ;;  %v1342_v10 = vmax.f32 %v1011_v5, %v1326_v3  ;;  %v1327_v19 = vmax.f32 %v1259_v36, 0.0  ;;  %v1329_v20 = vmax.f32 %v1312_v56, 0.0 }
 0x167   :  { %v1344_v8 = vmax.f32 %v2559_v7, %v1328_v4  ;;  %v1355_v40 = vmax.f32 %v2409_v58, %v1339_v9  ;;  %v2560_v60 = vmax.f32 %v2452_v48, 0.0  ;;  %v2561_v61 = vmax.f32 %v2455_v49, 0.0 }
 0x168   :  { %v1357_v54 = vmax.f32 %v2411_v59, %v1341_v25  ;;  %v1358_v55 = vmax.f32 %v2413_v62, %v1342_v10 }
 0x169   :  { %v1360_v38 = vmax.f32 %v2415_v63, %v1344_v8  ;;  %v1343_v39 = vmax.f32 %v2560_v60, %v1327_v19  ;;  %v1345_v43 = vmax.f32 %v2561_v61, %v1329_v20  ;;  %v1663_v5 = vpack.c.bf16 %v1355_v40, %v1354_v37 }
 0x16a   :  { %v1664_v17 = vpack.c.bf16 %v1357_v54, %v1356_v57 }
 0x16b   :  { %v1359_v45 = vmax.f32 %v2417_v0, %v1343_v39  ;;  %v1361_v18 = vmax.f32 %v2419_v2, %v1345_v43  ;;  %1417 = vst [vmem:[%s2556_s3 + $0x20] sm:$0xff] %v1663_v5 }
 0x16c   :  { %1418 = vst.msk [vmem:[%s2556_s3 + $0x28] sm:$0xff] %vm2481_vm2, %v1664_v17 }
 0x16d   :  { %v1665_v58 = vpack.c.bf16 %v1359_v45, %v1358_v55  ;;  %v1666_v59 = vpack.c.bf16 %v1361_v18, %v1360_v38 }
 0x16f   :  { %1419 = vst [vmem:[%s2556_s3 + $0x30] sm:$0xff] %v1665_v58  ;;  %1420 = vst.msk [vmem:[%s2556_s3 + $0x38] sm:$0xff] %vm2481_vm2, %v1666_v59 }

// kernel: mycnn_forward.4
= control target key start
LH: loop header
LB: loop body
LE: loop exit
PB: predicated region body
PF: predicated region fallthrough
CT: control target
= control target key end

     0   :  { %v3405_v1 = vmov 0   ;;  %v3406_v37 = vmov 0.0   ;;  %vm3407_vm0 = vmmov 0   ;;  %vm470_vm1 = vcmask 261120   ;;  %s4153_s0 = inlined_call_operand.vmem [shape: bf16[4,800,50], index: 0, kind: input, shape index: {}]   ;;  %s4154_s1 = inlined_call_operand.vmem [shape: bf16[16,800], index: 1, kind: input, shape index: {}]   ;;  %s4155_s2 = inlined_call_operand.vmem [shape: f32[16,1], index: 2, kind: input, shape index: {}]   ;;  %s4156_s3 = inlined_call_operand.vmem [shape: bf16[16,50], index: 3, kind: output, shape index: {}]  }
   0x1   :  { %v3189_v0 = vld [vmem:[%s4153_s0 + $0x40] sm:$0xff]   ;;  %3188 = vset.pattern.permute.xlu0 %v3405_v1  ;;  %v3193_v5 = vld [vmem:[%s4153_s0 + $0x48] sm:$0xff]   ;;  %v3197_v9 = vld [vmem:[%s4153_s0 + $0x50] sm:$0xff]   ;;  %vm2355_vm2 = vcmask 404480  }
   0x2   :  { %v3190_v2 = vld [vmem:[%s4153_s0 + $0xc0] sm:$0xff]   ;;  %2877 = vmatprep.subr.bf16.mxu0 %v3189_v0  ;;  %v3194_v6 = vld [vmem:[%s4153_s0 + $0xc8] sm:$0xff]   ;;  %v3198_v10 = vld [vmem:[%s4153_s0 + $0xd0] sm:$0xff]  }
   0x3   :  { %v3191_v3 = vld [vmem:[%s4153_s0] sm:$0xff]   ;;  %2899 = vmatprep.subr.bf16.mxu1 %v3190_v2  ;;  %v3195_v7 = vld [vmem:[%s4153_s0 + $0x8] sm:$0xff]   ;;  %v3199_v11 = vld [vmem:[%s4153_s0 + $0x10] sm:$0xff]  }
   0x4   :  { %v3192_v4 = vld [vmem:[%s4153_s0 + $0x80] sm:$0xff]   ;;  %2878 = vmatpush3.bf16.msra.mxu0 %v3191_v3  ;;  %v3196_v8 = vld [vmem:[%s4153_s0 + $0x88] sm:$0xff]   ;;  %v3200_v12 = vld [vmem:[%s4153_s0 + $0x90] sm:$0xff]  }
   0x5   :  { %2900 = vmatpush3.bf16.msra.mxu1 %v3192_v4  ;;  %2879 = vmatprep.subr.bf16.mxu0 %v3193_v5  ;;  %v3201_v13 = vld [vmem:[%s4153_s0 + $0x58] sm:$0xff]   ;;  %v3205_v17 = vld [vmem:[%s4153_s0 + $0x60] sm:$0xff]   ;;  %v3209_v21 = vld [vmem:[%s4153_s0 + $0x68] sm:$0xff]  }
   0x6   :  { %2901 = vmatprep.subr.bf16.mxu1 %v3194_v6  ;;  %v3202_v14 = vld [vmem:[%s4153_s0 + $0xd8] sm:$0xff]   ;;  %v3206_v18 = vld [vmem:[%s4153_s0 + $0xe0] sm:$0xff]   ;;  %v3210_v22 = vld [vmem:[%s4153_s0 + $0xe8] sm:$0xff]  }
   0x7   :  { %v3203_v15 = vld [vmem:[%s4153_s0 + $0x18] sm:$0xff]   ;;  %v3207_v19 = vld [vmem:[%s4153_s0 + $0x20] sm:$0xff]   ;;  %v3211_v23 = vld [vmem:[%s4153_s0 + $0x28] sm:$0xff]  }
   0x8   :  { %2880 = vmatpush3.bf16.msra.mxu0 %v3195_v7  ;;  %v3204_v16 = vld [vmem:[%s4153_s0 + $0x98] sm:$0xff]   ;;  %v3208_v20 = vld [vmem:[%s4153_s0 + $0xa0] sm:$0xff]   ;;  %v3212_v24 = vld [vmem:[%s4153_s0 + $0xa8] sm:$0xff]  }
   0x9   :  { %2902 = vmatpush3.bf16.msra.mxu1 %v3196_v8  ;;  %2881 = vmatprep.subr.bf16.mxu0 %v3197_v9  ;;  %v3213_v25 = vld [vmem:[%s4153_s0 + $0x70] sm:$0xff]   ;;  %v3217_v29 = vld [vmem:[%s4153_s0 + $0x78] sm:$0xff]   ;;  %v3527_v33 = vld [vmem:[%s4154_s1 + $0x4] ss:$28 sps:$4 sm:$0xff]  }
   0xa   :  { %2903 = vmatprep.subr.bf16.mxu1 %v3198_v10  ;;  %v3214_v26 = vld [vmem:[%s4153_s0 + $0xf0] sm:$0xff]   ;;  %v3218_v30 = vld [vmem:[%s4153_s0 + $0xf8] sm:$0xff]   ;;  %v3532_v34 = vld [vmem:[%s4154_s1 + $0xc] ss:$28 sps:$4 sm:$0xff]   ;;  %506 = vmatprep.mubr.bf16.mxu0 %v3527_v33 }
   0xb   :  { %v3215_v27 = vld [vmem:[%s4153_s0 + $0x30] sm:$0xff]   ;;  %v3219_v31 = vld [vmem:[%s4153_s0 + $0x38] sm:$0xff]   ;;  %v3543_v36 = vld [vmem:[%s4154_s1 + $0x8] ss:$28 sps:$4 sm:$0xff]   ;;  %547 = vmatprep.mubr.bf16.mxu1 %v3532_v34 }
   0xc   :  { %2882 = vmatpush3.bf16.msra.mxu0 %v3199_v11  ;;  %v3216_v28 = vld [vmem:[%s4153_s0 + $0xb0] sm:$0xff]   ;;  %v3220_v32 = vld [vmem:[%s4153_s0 + $0xb8] sm:$0xff]   ;;  %v3227_v38 = vld [vmem:[%s4153_s0 + $0x140] sm:$0xff]  }
   0xd   :  { %2904 = vmatpush3.bf16.msra.mxu1 %v3200_v12  ;;  %2883 = vmatprep.subr.bf16.mxu0 %v3201_v13  ;;  %v3538_v35 = vld [vmem:[%s4154_s1] ss:$28 sps:$4 sm:$0xff]   ;;  %v3230_v41 = vld [vmem:[%s4153_s0 + $0x148] sm:$0xff]   ;;  %v3233_v44 = vld [vmem:[%s4153_s0 + $0x150] sm:$0xff]  }
   0xe   :  { %2905 = vmatprep.subr.bf16.mxu1 %v3202_v14  ;;  %v3228_v39 = vld [vmem:[%s4153_s0 + $0x100] sm:$0xff]   ;;  %v3231_v42 = vld [vmem:[%s4153_s0 + $0x108] sm:$0xff]   ;;  %v3576_v45 = vld [vmem:[%s4154_s1 + $0x18] ss:$28 sps:$4 sm:$0xff]  }
   0xf   :  { %v3229_v40 = vld [vmem:[%s4153_s0 + $0x180] sm:$0xff]   ;;  %v3232_v43 = vld [vmem:[%s4153_s0 + $0x188] sm:$0xff]   ;;  %v3235_v46 = vld [vmem:[%s4153_s0 + $0x1d0] sm:$0xff]  }
  0x10   :  { %2884 = vmatpush3.bf16.msra.mxu0 %v3203_v15  ;;  %v3236_v47 = vld [vmem:[%s4153_s0 + $0x110] sm:$0xff]   ;;  %v3238_v49 = vld [vmem:[%s4153_s0 + $0x158] sm:$0xff]   ;;  %v3242_v53 = vld [vmem:[%s4153_s0 + $0x160] sm:$0xff]  }
  0x11   :  { %2906 = vmatpush3.bf16.msra.mxu1 %v3204_v16  ;;  %2885 = vmatprep.subr.bf16.mxu0 %v3205_v17  ;;  %v3237_v48 = vld [vmem:[%s4153_s0 + $0x190] sm:$0xff]   ;;  %v3239_v50 = vld [vmem:[%s4153_s0 + $0x1d8] sm:$0xff]   ;;  %v3243_v54 = vld [vmem:[%s4153_s0 + $0x1e0] sm:$0xff]  }
  0x12   :  { %2907 = vmatprep.subr.bf16.mxu1 %v3206_v18  ;;  %v3240_v51 = vld [vmem:[%s4153_s0 + $0x118] sm:$0xff]   ;;  %v3244_v55 = vld [vmem:[%s4153_s0 + $0x120] sm:$0xff]   ;;  %v3246_v57 = vld [vmem:[%s4153_s0 + $0x168] sm:$0xff]  }
  0x13   :  { %v3241_v52 = vld [vmem:[%s4153_s0 + $0x198] sm:$0xff]   ;;  %v3245_v56 = vld [vmem:[%s4153_s0 + $0x1a0] sm:$0xff]   ;;  %v3247_v58 = vld [vmem:[%s4153_s0 + $0x1e8] sm:$0xff]  }
  0x14   :  { %2886 = vmatpush3.bf16.msra.mxu0 %v3207_v19  ;;  %v3248_v59 = vld [vmem:[%s4153_s0 + $0x128] sm:$0xff]   ;;  %v3250_v61 = vld [vmem:[%s4153_s0 + $0x170] sm:$0xff]   ;;  %v3254_v1 = vld [vmem:[%s4153_s0 + $0x178] sm:$0xff]  }
  0x15   :  { %2908 = vmatpush3.bf16.msra.mxu1 %v3208_v20  ;;  %2887 = vmatprep.subr.bf16.mxu0 %v3209_v21  ;;  %v3249_v60 = vld [vmem:[%s4153_s0 + $0x1a8] sm:$0xff]   ;;  %v3251_v62 = vld [vmem:[%s4153_s0 + $0x1f0] sm:$0xff]   ;;  %v3255_v2 = vld [vmem:[%s4153_s0 + $0x1f8] sm:$0xff]  }
  0x16   :  { %2909 = vmatprep.subr.bf16.mxu1 %v3210_v22  ;;  %v3252_v63 = vld [vmem:[%s4153_s0 + $0x130] sm:$0xff]   ;;  %v3256_v3 = vld [vmem:[%s4153_s0 + $0x138] sm:$0xff]   ;;  %v3261_v7 = vld [vmem:[%s4153_s0 + $0x200] sm:$0xff]  }
  0x17   :  { %v3253_v0 = vld [vmem:[%s4153_s0 + $0x1b0] sm:$0xff]   ;;  %v3257_v4 = vld [vmem:[%s4153_s0 + $0x1b8] sm:$0xff]   ;;  %v3263_v9 = vld [vmem:[%s4153_s0 + $0x1c0] sm:$0xff]  }
  0x18   :  { %2888 = vmatpush3.bf16.msra.mxu0 %v3211_v23  ;;  %v3653_v5 = vld [vmem:[%s4154_s1 + $0x14] ss:$28 sps:$4 sm:$0xff]   ;;  %v3265_v11 = vld [vmem:[%s4153_s0 + $0x208] sm:$0xff]   ;;  %v3266_v12 = vld [vmem:[%s4153_s0 + $0x258] sm:$0xff]  }
  0x19   :  { %2910 = vmatpush3.bf16.msra.mxu1 %v3212_v24  ;;  %2889 = vmatprep.subr.bf16.mxu0 %v3213_v25  ;;  %v3658_v6 = vld [vmem:[%s4154_s1 + $0x10] ss:$28 sps:$4 sm:$0xff]   ;;  %v3268_v14 = vld [vmem:[%s4153_s0 + $0x218] sm:$0xff]   ;;  %v3269_v15 = vld [vmem:[%s4153_s0 + $0x260] sm:$0xff]  }
  0x1a   :  { %2911 = vmatprep.subr.bf16.mxu1 %v3214_v26  ;;  %v3262_v8 = vld [vmem:[%s4153_s0 + $0x250] sm:$0xff]   ;;  %v3267_v13 = vld [vmem:[%s4153_s0 + $0x1c8] sm:$0xff]   ;;  %v3271_v17 = vld [vmem:[%s4153_s0 + $0x220] sm:$0xff]  }
  0x1b   :  { %v3264_v10 = vld [vmem:[%s4153_s0 + $0x210] sm:$0xff]   ;;  %v3273_v19 = vld [vmem:[%s4153_s0 + $0x268] sm:$0xff]   ;;  %v3274_v20 = vld [vmem:[%s4153_s0 + $0x2d8] sm:$0xff]  }
  0x1c   :  { %2890 = vmatpush3.bf16.msra.mxu0 %v3215_v27  ;;  %v3270_v16 = vld [vmem:[%s4153_s0 + $0x2d0] sm:$0xff]   ;;  %v3275_v21 = vld [vmem:[%s4153_s0 + $0x228] sm:$0xff]   ;;  %v3276_v22 = vld [vmem:[%s4153_s0 + $0x298] sm:$0xff]  }
  0x1d   :  { %2912 = vmatpush3.bf16.msra.mxu1 %v3216_v28  ;;  %2891 = vmatprep.subr.bf16.mxu0 %v3217_v29  ;;  %v3272_v18 = vld [vmem:[%s4153_s0 + $0x290] sm:$0xff]   ;;  %v3278_v24 = vld [vmem:[%s4153_s0 + $0x2e0] sm:$0xff]   ;;  %v3281_v27 = vld [vmem:[%s4153_s0 + $0x278] sm:$0xff]  }
  0x1e   :  { %2913 = vmatprep.subr.bf16.mxu1 %v3218_v30  ;;  %v3277_v23 = vld [vmem:[%s4153_s0 + $0x270] sm:$0xff]   ;;  %v3280_v26 = vld [vmem:[%s4153_s0 + $0x2a0] sm:$0xff]   ;;  %v3282_v28 = vld [vmem:[%s4153_s0 + $0x2e8] sm:$0xff]  }
  0x1f   :  { %v3279_v25 = vld [vmem:[%s4153_s0 + $0x230] sm:$0xff]   ;;  %v3283_v29 = vld [vmem:[%s4153_s0 + $0x238] sm:$0xff]   ;;  %v3284_v30 = vld [vmem:[%s4153_s0 + $0x2a8] sm:$0xff]  }
  0x20   :  { %2892 = vmatpush3.bf16.msra.mxu0 %v3219_v31  ;;  %v3285_v31 = vld [vmem:[%s4153_s0 + $0x280] sm:$0xff]  }
  0x21   :  { %2914 = vmatpush3.bf16.msra.mxu1 %v3220_v32  ;;  %2921 = vmatprep.subr.bf16.mxu0 %v3227_v38  ;;  %v3286_v32 = vld [vmem:[%s4153_s0 + $0x2f0] sm:$0xff]   ;;  %v3287_v38 = vld [vmem:[%s4153_s0 + $0x240] sm:$0xff]  }
  0x22   :  { %3153 = vmatprep.subr.bf16.mxu1 %v3406_v37 }
  0x23   :  { %507 = vmatmul.mubr.bf16.vlgmr.msra.gmra.mrb[0].mxu0 %v3538_v35 }
  0x24   :  { %548 = vmatmul.mubr.bf16.vlgmr.msra.gmra.mrb[0].mxu1 %v3543_v36  ;;  %2922 = vmatpush3.bf16.msra.mxu0 %v3228_v39  ;;  %v3288_v39 = vld [vmem:[%s4153_s0 + $0x2b0] sm:$0xff]  }
  0x25   :  { %3157 = vmatprep.mubr.msk.bf16.mxu1 %vm3407_vm0, %v3406_v37  ;;  %3154 = vmatpush3.bf16.msra.mxu1 %v3229_v40  ;;  %v3289_v40 = vld [vmem:[%s4153_s0 + $0x288] sm:$0xff]  }
  0x26   :  { %2923 = vmatprep.subr.bf16.mxu0 %v3230_v41  ;;  %3155 = vmatprep.subr.bf16.mxu1 %v3406_v37  ;;  %v3290_v41 = vld [vmem:[%s4153_s0 + $0x2f8] sm:$0xff]  }
  0x27   :  { %588 = vmatprep.mubr.bf16.mxu0 %v3653_v5 }
  0x28   :  { %2924 = vmatpush3.bf16.msra.mxu0 %v3231_v42  ;;  %v3291_v42 = vld [vmem:[%s4153_s0 + $0x248] sm:$0xff]  }
  0x29   :  { %3156 = vmatpush3.bf16.msra.mxu1 %v3232_v43  ;;  %2925 = vmatprep.subr.bf16.mxu0 %v3233_v44  ;;  %v3292_v43 = vld [vmem:[%s4153_s0 + $0x2b8] sm:$0xff]   ;;  %v3293_v44 = vld [vmem:[%s4153_s0 + $0x300] sm:$0xff]  }
  0x2a   :  { %2946 = vmatprep.subr.bf16.mxu1 %v3235_v46  ;;  %v3294_v46 = vld [vmem:[%s4153_s0 + $0x2c0] sm:$0xff]  }
  0x2c   :  { %3158 = vmatmul.mubr.msk.bf16.vlgmr.msra.gmra.mrb[4].mxu1 %vm470_vm1, %v3576_v45  ;;  %2926 = vmatpush3.bf16.msra.mxu0 %v3236_v47  ;;  %v3295_v47 = vld [vmem:[%s4153_s0 + $0x310] sm:$0xff]  }
  0x2d   :  { %2947 = vmatpush3.bf16.msra.mxu1 %v3237_v48  ;;  %1073 = vmatprep.mubr.bf16.mxu1 %v3527_v33  ;;  %v3296_v48 = vld [vmem:[%s4153_s0 + $0x308] sm:$0xff]  }
  0x2e   :  { %2927 = vmatprep.subr.bf16.mxu0 %v3238_v49  ;;  %2948 = vmatprep.subr.bf16.mxu1 %v3239_v50  ;;  %v3297_v49 = vld [vmem:[%s4153_s0 + $0x2c8] sm:$0xff]   ;;  %v3298_v50 = vld [vmem:[%s4153_s0 + $0x318] sm:$0xff]  }
  0x30   :  { %2928 = vmatpush3.bf16.msra.mxu0 %v3240_v51  ;;  %v3299_v51 = vld [vmem:[%s4153_s0 + $0x360] sm:$0xff]  }
  0x31   :  { %2949 = vmatpush3.bf16.msra.mxu1 %v3241_v52  ;;  %2929 = vmatprep.subr.bf16.mxu0 %v3242_v53  ;;  %v3300_v52 = vld [vmem:[%s4153_s0 + $0x3e0] sm:$0xff]  }
  0x32   :  { %2950 = vmatprep.subr.bf16.mxu1 %v3243_v54  ;;  %v3301_v53 = vld [vmem:[%s4153_s0 + $0x320] sm:$0xff]  }
  0x33   :  { %v3302_v54 = vld [vmem:[%s4153_s0 + $0x3a0] sm:$0xff]  }
  0x34   :  { %2930 = vmatpush3.bf16.msra.mxu0 %v3244_v55  ;;  %v3303_v55 = vld [vmem:[%s4153_s0 + $0x368] sm:$0xff]  }
  0x35   :  { %2951 = vmatpush3.bf16.msra.mxu1 %v3245_v56  ;;  %2931 = vmatprep.subr.bf16.mxu0 %v3246_v57  ;;  %v3304_v56 = vld [vmem:[%s4153_s0 + $0x3e8] sm:$0xff]  }
  0x36   :  { %2952 = vmatprep.subr.bf16.mxu1 %v3247_v58  ;;  %v3305_v57 = vld [vmem:[%s4153_s0 + $0x328] sm:$0xff]  }
  0x37   :  { %v3306_v58 = vld [vmem:[%s4153_s0 + $0x3a8] sm:$0xff]  }
  0x38   :  { %2932 = vmatpush3.bf16.msra.mxu0 %v3248_v59  ;;  %v3307_v59 = vld [vmem:[%s4153_s0 + $0x370] sm:$0xff]  }
  0x39   :  { %2953 = vmatpush3.bf16.msra.mxu1 %v3249_v60  ;;  %2933 = vmatprep.subr.bf16.mxu0 %v3250_v61  ;;  %v3308_v60 = vld [vmem:[%s4153_s0 + $0x3f0] sm:$0xff]  }
  0x3a   :  { %2954 = vmatprep.subr.bf16.mxu1 %v3251_v62  ;;  %v3309_v61 = vld [vmem:[%s4153_s0 + $0x330] sm:$0xff]  }
  0x3b   :  { %v3310_v62 = vld [vmem:[%s4153_s0 + $0x3b0] sm:$0xff]  }
  0x3c   :  { %2934 = vmatpush3.bf16.msra.mxu0 %v3252_v63  ;;  %v3311_v63 = vld [vmem:[%s4153_s0 + $0x378] sm:$0xff]  }
  0x3d   :  { %2955 = vmatpush3.bf16.msra.mxu1 %v3253_v0  ;;  %2935 = vmatprep.subr.bf16.mxu0 %v3254_v1  ;;  %v3313_v0 = vld [vmem:[%s4153_s0 + $0x338] sm:$0xff]  }
  0x3e   :  { %2956 = vmatprep.subr.bf16.mxu1 %v3255_v2  ;;  %v3314_v1 = vld [vmem:[%s4153_s0 + $0x3b8] sm:$0xff]   ;;  %v3315_v2 = vld [vmem:[%s4153_s0 + $0x380] sm:$0xff]  }
  0x40   :  { %2936 = vmatpush3.bf16.msra.mxu0 %v3256_v3  ;;  %v3316_v3 = vld [vmem:[%s4153_s0 + $0x400] sm:$0xff]  }
  0x41   :  { %2957 = vmatpush3.bf16.msra.mxu1 %v3257_v4  ;;  %2968 = vmatprep.subr.bf16.mxu0 %v3262_v8  ;;  %v24_v4 = vld [vmem:[%s4155_s2 + $0x8] sm:$0xff]  ;;  %v3318_v8 = vld [vmem:[%s4153_s0 + $0x3c0] sm:$0xff]  }
  0x42   :  { %2958 = vmatprep.subr.bf16.mxu1 %v3261_v7  ;;  %v3317_v7 = vld [vmem:[%s4153_s0 + $0x340] sm:$0xff]  }
  0x43   :  { %589 = vmatmul.mubr.bf16.vlgmr.msra.gmra.mrb[4].mxu0 %v3658_v6 }
  0x44   :  { %1114 = vmatprep.mubr.bf16.mxu0 %v3532_v34  ;;  %2969 = vmatpush3.bf16.msra.mxu0 %v3264_v10  ;;  %v3320_v10 = vld [vmem:[%s4153_s0 + $0x408] sm:$0xff]  }
  0x45   :  { %2959 = vmatpush3.bf16.msra.mxu1 %v3263_v9  ;;  %2970 = vmatprep.subr.bf16.mxu0 %v3266_v12  ;;  %v3319_v9 = vld [vmem:[%s4153_s0 + $0x388] sm:$0xff]  }
  0x46   :  { %2960 = vmatprep.subr.bf16.mxu1 %v3265_v11  ;;  %v3321_v11 = vld [vmem:[%s4153_s0 + $0x348] sm:$0xff]  }
  0x47   :  { %v3322_v12 = vld [vmem:[%s4153_s0 + $0x3c8] sm:$0xff]  }
  0x48   :  { %2971 = vmatpush3.bf16.msra.mxu0 %v3268_v14  ;;  %v3324_v14 = vld [vmem:[%s4153_s0 + $0x410] sm:$0xff]  }
  0x49   :  { %2961 = vmatpush3.bf16.msra.mxu1 %v3267_v13  ;;  %2972 = vmatprep.subr.bf16.mxu0 %v3269_v15  ;;  %v3323_v13 = vld [vmem:[%s4153_s0 + $0x390] sm:$0xff]  }
  0x4a   :  { %2990 = vmatprep.subr.bf16.mxu1 %v3270_v16  ;;  %v3325_v15 = vld [vmem:[%s4153_s0 + $0x350] sm:$0xff]  }
  0x4b   :  { %v3326_v16 = vld [vmem:[%s4153_s0 + $0x3d0] sm:$0xff]  }
  0x4c   :  { %1074 = vmatmul.mubr.bf16.vlgmr.msra.gmra.mrb[8].mxu1 %v3538_v35  ;;  %2973 = vmatpush3.bf16.msra.mxu0 %v3271_v17  ;;  %v3327_v17 = vld [vmem:[%s4153_s0 + $0x398] sm:$0xff]  }
  0x4d   :  { %1155 = vmatprep.mubr.bf16.mxu1 %v3653_v5  ;;  %2991 = vmatpush3.bf16.msra.mxu1 %v3272_v18  ;;  %v3328_v18 = vld [vmem:[%s4153_s0 + $0x418] sm:$0xff]  }
  0x4e   :  { %2974 = vmatprep.subr.bf16.mxu0 %v3273_v19  ;;  %2992 = vmatprep.subr.bf16.mxu1 %v3274_v20  ;;  %v3329_v19 = vld [vmem:[%s4153_s0 + $0x358] sm:$0xff]  }
  0x4f   :  { %v3330_v20 = vld [vmem:[%s4153_s0 + $0x3d8] sm:$0xff]  }
  0x50   :  { %2975 = vmatpush3.bf16.msra.mxu0 %v3275_v21  ;;  %v3331_v21 = vld [vmem:[%s4153_s0 + $0x460] sm:$0xff]  }
  0x51   :  { %2993 = vmatpush3.bf16.msra.mxu1 %v3276_v22  ;;  %2976 = vmatprep.subr.bf16.mxu0 %v3277_v23  ;;  %v3332_v22 = vld [vmem:[%s4153_s0 + $0x420] sm:$0xff]  }
  0x52   :  { %2994 = vmatprep.subr.bf16.mxu1 %v3278_v24  ;;  %v3333_v23 = vld [vmem:[%s4153_s0 + $0x4a0] sm:$0xff]   ;;  %v3334_v24 = vld [vmem:[%s4153_s0 + $0x468] sm:$0xff]  }
  0x54   :  { %2977 = vmatpush3.bf16.msra.mxu0 %v3279_v25  ;;  %v3335_v25 = vld [vmem:[%s4153_s0 + $0x428] sm:$0xff]  }
  0x55   :  { %2995 = vmatpush3.bf16.msra.mxu1 %v3280_v26  ;;  %2978 = vmatprep.subr.bf16.mxu0 %v3281_v27  ;;  %v3336_v26 = vld [vmem:[%s4153_s0 + $0x4a8] sm:$0xff]   ;;  %v3337_v27 = vld [vmem:[%s4153_s0 + $0x470] sm:$0xff]  }
  0x56   :  { %2996 = vmatprep.subr.bf16.mxu1 %v3282_v28  ;;  %v3338_v28 = vld [vmem:[%s4153_s0 + $0x4f0] sm:$0xff]  }
  0x58   :  { %2979 = vmatpush3.bf16.msra.mxu0 %v3283_v29  ;;  %v3341_v29 = vld [vmem:[%s4153_s0 + $0x478] sm:$0xff]  }
  0x59   :  { %2997 = vmatpush3.bf16.msra.mxu1 %v3284_v30  ;;  %2980 = vmatprep.subr.bf16.mxu0 %v3285_v31  ;;  %v3342_v30 = vld [vmem:[%s4153_s0 + $0x4f8] sm:$0xff]  }
  0x5a   :  { %2998 = vmatprep.subr.bf16.mxu1 %v3286_v32  ;;  %v3343_v31 = vld [vmem:[%s4153_s0 + $0x438] sm:$0xff]  }
  0x5b   :  { %v3344_v32 = vld [vmem:[%s4153_s0 + $0x4b8] sm:$0xff]  }
  0x5c   :  { %2981 = vmatpush3.bf16.msra.mxu0 %v3287_v38  ;;  %v3345_v38 = vld [vmem:[%s4153_s0 + $0x480] sm:$0xff]  }
  0x5d   :  { %2999 = vmatpush3.bf16.msra.mxu1 %v3288_v39  ;;  %2982 = vmatprep.subr.bf16.mxu0 %v3289_v40  ;;  %v3346_v39 = vld [vmem:[%s4153_s0 + $0x500] sm:$0xff]  }
  0x5e   :  { %3000 = vmatprep.subr.bf16.mxu1 %v3290_v41  ;;  %v3399_v40 = vld [vmem:[%s4154_s1 + $0x4] ss:$28 sps:$4 sm:$0xff]  }
  0x5f   :  { %v3348_v41 = vld [vmem:[%s4153_s0 + $0x4c0] sm:$0xff]  }
  0x60   :  { %2983 = vmatpush3.bf16.msra.mxu0 %v3291_v42  ;;  %v3349_v42 = vld [vmem:[%s4153_s0 + $0x488] sm:$0xff]  }
  0x61   :  { %3001 = vmatpush3.bf16.msra.mxu1 %v3292_v43  ;;  %3161 = vmatprep.subr.bf16.mxu0 %v3406_v37  ;;  %v3350_v43 = vld [vmem:[%s4153_s0 + $0x508] sm:$0xff]  }
  0x62   :  { %3002 = vmatprep.subr.bf16.mxu1 %v3293_v44  ;;  %v3351_v44 = vld [vmem:[%s4153_s0 + $0x448] sm:$0xff]  }
  0x63   :  { %1115 = vmatmul.mubr.bf16.vlgmr.msra.gmra.mrb[8].mxu0 %v3543_v36 }
  0x64   :  { %3162 = vmatpush3.bf16.msra.mxu0 %v3295_v47  ;;  %3165 = vmatprep.mubr.msk.bf16.mxu0 %vm3407_vm0, %v3406_v37  ;;  %v3353_v47 = vld [vmem:[%s4153_s0 + $0x490] sm:$0xff]  }
  0x65   :  { %3003 = vmatpush3.bf16.msra.mxu1 %v3294_v46  ;;  %3163 = vmatprep.subr.bf16.mxu0 %v3406_v37  ;;  %v3352_v46 = vld [vmem:[%s4153_s0 + $0x4c8] sm:$0xff]  }
  0x66   :  { %3004 = vmatprep.subr.bf16.mxu1 %v3296_v48  ;;  %v3354_v48 = vld [vmem:[%s4153_s0 + $0x510] sm:$0xff]  }
  0x68   :  { %3164 = vmatpush3.bf16.msra.mxu0 %v3298_v50  ;;  %v3356_v50 = vld [vmem:[%s4153_s0 + $0x4d0] sm:$0xff]  }
  0x69   :  { %3005 = vmatpush3.bf16.msra.mxu1 %v3297_v49  ;;  %3015 = vmatprep.subr.bf16.mxu0 %v3299_v51  ;;  %v3355_v49 = vld [vmem:[%s4153_s0 + $0x450] sm:$0xff]   ;;  %v3357_v51 = vld [vmem:[%s4153_s0 + $0x498] sm:$0xff]  }
  0x6a   :  { %3037 = vmatprep.subr.bf16.mxu1 %v3300_v52  ;;  %v3358_v52 = vld [vmem:[%s4153_s0 + $0x518] sm:$0xff]  }
  0x6b   :  { %3166 = vmatmul.mubr.msk.bf16.vlgmr.msra.gmra.mrb[12].mxu0 %vm470_vm1, %v3576_v45 }
  0x6c   :  { %1156 = vmatmul.mubr.bf16.vlgmr.msra.gmra.mrb[12].mxu1 %v3658_v6  ;;  %3016 = vmatpush3.bf16.msra.mxu0 %v3301_v53  ;;  %v3359_v53 = vld [vmem:[%s4153_s0 + $0x458] sm:$0xff]  }
  0x6d   :  { %3038 = vmatpush3.bf16.msra.mxu1 %v3302_v54  ;;  %3017 = vmatprep.subr.bf16.mxu0 %v3303_v55  ;;  %v3360_v54 = vld [vmem:[%s4153_s0 + $0x4d8] sm:$0xff]   ;;  %v3361_v55 = vld [vmem:[%s4153_s0 + $0x520] sm:$0xff]  }
  0x6e   :  { %3039 = vmatprep.subr.bf16.mxu1 %v3304_v56  ;;  %1642 = vmatprep.mubr.bf16.mxu0 %v3527_v33  ;;  %v3312_v33 = vld [vmem:[%s4153_s0 + $0x3f8] sm:$0xff]   ;;  %v3362_v56 = vld [vmem:[%s4153_s0 + $0x570] sm:$0xff]  }
  0x6f   :  { %1683 = vmatprep.mubr.bf16.mxu1 %v3532_v34  ;;  %v23_v34 = vld [vmem:[%s4155_s2] sm:$0xff] }
  0x70   :  { %3018 = vmatpush3.bf16.msra.mxu0 %v3305_v57  ;;  %127 = vperm.xlu0 %3188, %v23_v34   ;;  %v3363_v57 = vld [vmem:[%s4153_s0 + $0x4e0] sm:$0xff]   ;;  %v3400_v34 = vld [vmem:[%s4154_s1 + $0xc] ss:$28 sps:$4 sm:$0xff]  }
  0x71   :  { %3040 = vmatpush3.bf16.msra.mxu1 %v3306_v58  ;;  %3019 = vmatprep.subr.bf16.mxu0 %v3307_v59  ;;  %v3364_v58 = vld [vmem:[%s4153_s0 + $0x530] sm:$0xff]   ;;  %v3365_v59 = vld [vmem:[%s4153_s0 + $0x528] sm:$0xff]  }
  0x72   :  { %3041 = vmatprep.subr.bf16.mxu1 %v3308_v60  ;;  %v3366_v60 = vld [vmem:[%s4153_s0 + $0x578] sm:$0xff]  }
  0x74   :  { %3020 = vmatpush3.bf16.msra.mxu0 %v3309_v61  ;;  %132 = vperm.xlu0 %3188, %v24_v4   ;;  %v3367_v61 = vld [vmem:[%s4153_s0 + $0x4e8] sm:$0xff]   ;;  %v3401_v4 = vld [vmem:[%s4154_s1] ss:$28 sps:$4 sm:$0xff]  }
  0x75   :  { %3042 = vmatpush3.bf16.msra.mxu1 %v3310_v62  ;;  %3021 = vmatprep.subr.bf16.mxu0 %v3311_v63  ;;  %v3368_v62 = vld [vmem:[%s4153_s0 + $0x538] sm:$0xff]   ;;  %v3369_v63 = vld [vmem:[%s4153_s0 + $0x580] sm:$0xff]  }
  0x76   :  { %3043 = vmatprep.subr.bf16.mxu1 %v3312_v33  ;;  %v3370_v33 = vld [vmem:[%s4153_s0 + $0x5f0] sm:$0xff]  }
  0x78   :  { %3022 = vmatpush3.bf16.msra.mxu0 %v3313_v0  ;;  %v3372_v0 = vld [vmem:[%s4153_s0 + $0x5b0] sm:$0xff]  }
  0x79   :  { %3044 = vmatpush3.bf16.msra.mxu1 %v3314_v1  ;;  %3023 = vmatprep.subr.bf16.mxu0 %v3315_v2  ;;  %v3373_v1 = vld [vmem:[%s4153_s0 + $0x588] sm:$0xff]   ;;  %v3374_v2 = vld [vmem:[%s4153_s0 + $0x5f8] sm:$0xff]  }
  0x7a   :  { %3045 = vmatprep.subr.bf16.mxu1 %v3316_v3  ;;  %v3375_v3 = vld [vmem:[%s4153_s0 + $0x548] sm:$0xff]  }
  0x7c   :  { %3024 = vmatpush3.bf16.msra.mxu0 %v3317_v7  ;;  %v3376_v7 = vld [vmem:[%s4153_s0 + $0x5b8] sm:$0xff]  }
  0x7d   :  { %3046 = vmatpush3.bf16.msra.mxu1 %v3318_v8  ;;  %3025 = vmatprep.subr.bf16.mxu0 %v3319_v9  ;;  %v3377_v8 = vld [vmem:[%s4153_s0 + $0x590] sm:$0xff]   ;;  %v3378_v9 = vld [vmem:[%s4153_s0 + $0x600] sm:$0xff]  }
  0x7e   :  { %3047 = vmatprep.subr.bf16.mxu1 %v3320_v10  ;;  %v3379_v10 = vld [vmem:[%s4153_s0 + $0x550] sm:$0xff]  }
  0x80   :  { %3026 = vmatpush3.bf16.msra.mxu0 %v3321_v11  ;;  %v3380_v11 = vld [vmem:[%s4153_s0 + $0x5c0] sm:$0xff]  }
  0x81   :  { %3048 = vmatpush3.bf16.msra.mxu1 %v3322_v12  ;;  %3027 = vmatprep.subr.bf16.mxu0 %v3323_v13  ;;  %v3381_v12 = vld [vmem:[%s4153_s0 + $0x598] sm:$0xff]   ;;  %v3382_v13 = vld [vmem:[%s4153_s0 + $0x608] sm:$0xff]  }
  0x82   :  { %3049 = vmatprep.subr.bf16.mxu1 %v3324_v14  ;;  %v3384_v14 = vld [vmem:[%s4153_s0 + $0x5c8] sm:$0xff]  }
  0x84   :  { %3028 = vmatpush3.bf16.msra.mxu0 %v3325_v15  ;;  %v3385_v15 = vld [vmem:[%s4153_s0 + $0x5a0] sm:$0xff]  }
  0x85   :  { %3050 = vmatpush3.bf16.msra.mxu1 %v3326_v16  ;;  %3029 = vmatprep.subr.bf16.mxu0 %v3327_v17  ;;  %v3386_v16 = vld [vmem:[%s4153_s0 + $0x610] sm:$0xff]   ;;  %v3387_v17 = vld [vmem:[%s4153_s0 + $0x560] sm:$0xff]  }
  0x86   :  { %3051 = vmatprep.subr.bf16.mxu1 %v3328_v18  ;;  %v3388_v18 = vld [vmem:[%s4153_s0 + $0x5d0] sm:$0xff]  }
  0x88   :  { %3030 = vmatpush3.bf16.msra.mxu0 %v3329_v19  ;;  %v3389_v19 = vld [vmem:[%s4153_s0 + $0x5a8] sm:$0xff]  }
  0x89   :  { %3052 = vmatpush3.bf16.msra.mxu1 %v3330_v20  ;;  %3059 = vmatprep.subr.bf16.mxu0 %v3331_v21  ;;  %v3390_v20 = vld [vmem:[%s4153_s0 + $0x618] sm:$0xff]   ;;  %v3391_v21 = vld [vmem:[%s4153_s0 + $0x568] sm:$0xff]  }
  0x8a   :  { %3169 = vmatprep.subr.bf16.mxu1 %v3406_v37 }
  0x8b   :  { %1643 = vmatmul.mubr.bf16.vlgmr.msra.gmra.mrb[16].mxu0 %v3538_v35  ;;  %v3339_v35 = vld [vmem:[%s4153_s0 + $0x430] sm:$0xff]  }
  0x8c   :  { %1684 = vmatmul.mubr.bf16.vlgmr.msra.gmra.mrb[16].mxu1 %v3543_v36  ;;  %3060 = vmatpush3.bf16.msra.mxu0 %v3332_v22  ;;  %v3340_v36 = vld [vmem:[%s4153_s0 + $0x4b0] sm:$0xff]   ;;  %v3392_v22 = vld [vmem:[%s4153_s0 + $0x5d8] sm:$0xff]  }
  0x8d   :  { %3170 = vmatpush3.bf16.msra.mxu1 %v3333_v23  ;;  %3061 = vmatprep.subr.bf16.mxu0 %v3334_v24  ;;  %v3393_v23 = vld [vmem:[%s4153_s0 + $0x620] sm:$0xff]  }
  0x8e   :  { %3171 = vmatprep.subr.bf16.mxu1 %v3406_v37  ;;  %3173 = vmatprep.mubr.msk.bf16.mxu1 %vm3407_vm0, %v3406_v37  ;;  %v3394_v24 = vld [vmem:[%s4153_s0 + $0x5e0] sm:$0xff]  }
  0x8f   :  { %1724 = vmatprep.mubr.bf16.mxu0 %v3653_v5 }
  0x90   :  { %3062 = vmatpush3.bf16.msra.mxu0 %v3335_v25  ;;  %v3395_v25 = vld [vmem:[%s4153_s0 + $0x630] sm:$0xff]  }
  0x91   :  { %3172 = vmatpush3.bf16.msra.mxu1 %v3336_v26  ;;  %3063 = vmatprep.subr.bf16.mxu0 %v3337_v27  ;;  %v3396_v26 = vld [vmem:[%s4153_s0 + $0x628] sm:$0xff]  }
  0x92   :  { %3084 = vmatprep.subr.bf16.mxu1 %v3338_v28  ;;  %v3402_v27 = vld [vmem:[%s4154_s1 + $0x8] ss:$28 sps:$4 sm:$0xff]  }
  0x93   :  { %v3397_v28 = vld [vmem:[%s4153_s0 + $0x5e8] sm:$0xff]  }
  0x94   :  { %3174 = vmatmul.mubr.msk.bf16.vlgmr.msra.gmra.mrb[20].mxu1 %vm470_vm1, %v3576_v45  ;;  %3064 = vmatpush3.bf16.msra.mxu0 %v3339_v35  ;;  %v3347_v45 = vld [vmem:[%s4153_s0 + $0x440] sm:$0xff]   ;;  %v3398_v35 = vld [vmem:[%s4153_s0 + $0x638] sm:$0xff]  }
  0x95   :  { %3085 = vmatpush3.bf16.msra.mxu1 %v3340_v36  ;;  %3065 = vmatprep.subr.bf16.mxu0 %v3341_v29  ;;  %v3403_v36 = vld [vmem:[%s4154_s1 + $0x10] ss:$28 sps:$4 sm:$0xff]   ;;  %v3404_v29 = vld [vmem:[%s4154_s1 + $0x18] ss:$28 sps:$4 sm:$0xff]  }
  0x96   :  { %3086 = vmatprep.subr.bf16.mxu1 %v3342_v30  ;;  %2209 = vmatprep.mubr.bf16.mxu1 %v3399_v40 }
  0x98   :  { %3066 = vmatpush3.bf16.msra.mxu0 %v3343_v31 }
  0x99   :  { %3087 = vmatpush3.bf16.msra.mxu1 %v3344_v32  ;;  %3067 = vmatprep.subr.bf16.mxu0 %v3345_v38 }
  0x9a   :  { %3088 = vmatprep.subr.bf16.mxu1 %v3346_v39 }
  0x9c   :  { %3068 = vmatpush3.bf16.msra.mxu0 %v3347_v45 }
  0x9d   :  { %3089 = vmatpush3.bf16.msra.mxu1 %v3348_v41  ;;  %3069 = vmatprep.subr.bf16.mxu0 %v3349_v42 }
  0x9e   :  { %3090 = vmatprep.subr.bf16.mxu1 %v3350_v43 }
  0xa0   :  { %3070 = vmatpush3.bf16.msra.mxu0 %v3351_v44 }
  0xa1   :  { %3091 = vmatpush3.bf16.msra.mxu1 %v3352_v46  ;;  %3071 = vmatprep.subr.bf16.mxu0 %v3353_v47 }
  0xa2   :  { %3092 = vmatprep.subr.bf16.mxu1 %v3354_v48 }
  0xa4   :  { %3072 = vmatpush3.bf16.msra.mxu0 %v3355_v49 }
  0xa5   :  { %3093 = vmatpush3.bf16.msra.mxu1 %v3356_v50  ;;  %3073 = vmatprep.subr.bf16.mxu0 %v3357_v51 }
  0xa6   :  { %3094 = vmatprep.subr.bf16.mxu1 %v3358_v52 }
  0xa8   :  { %3074 = vmatpush3.bf16.msra.mxu0 %v3359_v53 }
  0xa9   :  { %3095 = vmatpush3.bf16.msra.mxu1 %v3360_v54  ;;  %3106 = vmatprep.subr.bf16.mxu0 %v3362_v56 }
  0xaa   :  { %3096 = vmatprep.subr.bf16.mxu1 %v3361_v55 }
  0xab   :  { %1725 = vmatmul.mubr.bf16.vlgmr.msra.gmra.mrb[20].mxu0 %v3658_v6  ;;  %v3371_v6 = vld [vmem:[%s4153_s0 + $0x540] sm:$0xff]  }
  0xac   :  { %3107 = vmatpush3.bf16.msra.mxu0 %v3364_v58  ;;  %2250 = vmatprep.mubr.bf16.mxu0 %v3400_v34 }
  0xad   :  { %3097 = vmatpush3.bf16.msra.mxu1 %v3363_v57  ;;  %3108 = vmatprep.subr.bf16.mxu0 %v3366_v60 }
  0xae   :  { %3098 = vmatprep.subr.bf16.mxu1 %v3365_v59 }
  0xb0   :  { %3109 = vmatpush3.bf16.msra.mxu0 %v3368_v62 }
  0xb1   :  { %3099 = vmatpush3.bf16.msra.mxu1 %v3367_v61  ;;  %3110 = vmatprep.subr.bf16.mxu0 %v3369_v63 }
  0xb2   :  { %3128 = vmatprep.subr.bf16.mxu1 %v3370_v33 }
  0xb4   :  { %2210 = vmatmul.mubr.bf16.vlgmr.msra.gmra.mrb[24].mxu1 %v3401_v4  ;;  %3111 = vmatpush3.bf16.msra.mxu0 %v3371_v6 }
  0xb5   :  { %3129 = vmatpush3.bf16.msra.mxu1 %v3372_v0  ;;  %3112 = vmatprep.subr.bf16.mxu0 %v3373_v1 }
  0xb6   :  { %3130 = vmatprep.subr.bf16.mxu1 %v3374_v2  ;;  %2291 = vmatprep.mubr.bf16.mxu1 %v3653_v5  ;;  %v3383_v5 = vld [vmem:[%s4153_s0 + $0x558] sm:$0xff]  }
  0xb8   :  { %3113 = vmatpush3.bf16.msra.mxu0 %v3375_v3 }
  0xb9   :  { %3131 = vmatpush3.bf16.msra.mxu1 %v3376_v7  ;;  %3114 = vmatprep.subr.bf16.mxu0 %v3377_v8 }
  0xba   :  { %3132 = vmatprep.subr.bf16.mxu1 %v3378_v9 }
  0xbc   :  { %3115 = vmatpush3.bf16.msra.mxu0 %v3379_v10 }
  0xbd   :  { %3133 = vmatpush3.bf16.msra.mxu1 %v3380_v11  ;;  %3116 = vmatprep.subr.bf16.mxu0 %v3381_v12 }
  0xbe   :  { %3134 = vmatprep.subr.bf16.mxu1 %v3382_v13 }
  0xc0   :  { %3117 = vmatpush3.bf16.msra.mxu0 %v3383_v5 }
  0xc1   :  { %3135 = vmatpush3.bf16.msra.mxu1 %v3384_v14  ;;  %3118 = vmatprep.subr.bf16.mxu0 %v3385_v15 }
  0xc2   :  { %3136 = vmatprep.subr.bf16.mxu1 %v3386_v16 }
  0xc4   :  { %3119 = vmatpush3.bf16.msra.mxu0 %v3387_v17 }
  0xc5   :  { %3137 = vmatpush3.bf16.msra.mxu1 %v3388_v18  ;;  %3120 = vmatprep.subr.bf16.mxu0 %v3389_v19 }
  0xc6   :  { %3138 = vmatprep.subr.bf16.mxu1 %v3390_v20 }
  0xc8   :  { %3121 = vmatpush3.bf16.msra.mxu0 %v3391_v21 }
  0xc9   :  { %3139 = vmatpush3.bf16.msra.mxu1 %v3392_v22  ;;  %3177 = vmatprep.subr.bf16.mxu0 %v3406_v37 }
  0xca   :  { %3140 = vmatprep.subr.bf16.mxu1 %v3393_v23 }
  0xcb   :  { %2251 = vmatmul.mubr.bf16.vlgmr.msra.gmra.mrb[24].mxu0 %v3402_v27 }
  0xcc   :  { %3178 = vmatpush3.bf16.msra.mxu0 %v3395_v25  ;;  %3181 = vmatprep.mubr.msk.bf16.mxu0 %vm3407_vm0, %v3406_v37 }
  0xcd   :  { %3141 = vmatpush3.bf16.msra.mxu1 %v3394_v24  ;;  %3179 = vmatprep.subr.bf16.mxu0 %v3406_v37 }
  0xce   :  { %3142 = vmatprep.subr.bf16.mxu1 %v3396_v26 }
  0xd0   :  { %3180 = vmatpush3.bf16.msra.mxu0 %v3398_v35 }
  0xd1   :  { %3143 = vmatpush3.bf16.msra.mxu1 %v3397_v28 }
  0xd3   :  { %3182 = vmatmul.mubr.msk.bf16.vlgmr.msra.gmra.mrb[28].mxu0 %vm470_vm1, %v3404_v29 }
  0xd4   :  { %2292 = vmatmul.mubr.bf16.vlgmr.msra.gmra.mrb[28].mxu1 %v3403_v36 }
  0xef   :  { %v4129_v39 = vpop.permute.xlu0 %127 }
  0xf3   :  { %v4132_v49 = vpop.permute.xlu0 %132 }
  0xf6   :  { %v2893_v30 = vpop.f32.mrb[0].mxu0 }
  0xf7   :  { %v2915_v31 = vpop.f32.mrb[0].mxu1  ;;  %v2894_v32 = vpop.f32.mrb[1].mxu0 }
  0xf8   :  { %v2916_v38 = vpop.f32.mrb[1].mxu1  ;;  %v2895_v37 = vadd.f32 %v2894_v32, %v2893_v30  ;;  %v2896_v40 = vpop.f32.mrb[2].mxu0 }
  0xf9   :  { %v2917_v45 = vadd.f32 %v2916_v38, %v2915_v31  ;;  %v2918_v41 = vpop.f32.mrb[2].mxu1  ;;  %v2897_v42 = vpop.f32.mrb[3].mxu0 }
  0xfa   :  { %v509_v43 = vadd.f32 %v2895_v37, %v4129_v39  ;;  %v2898_v44 = vadd.f32 %v2897_v42, %v2896_v40  ;;  %v2919_v46 = vpop.f32.mrb[3].mxu1 }
  0xfb   :  { %v2920_v47 = vadd.f32 %v2919_v46, %v2918_v41 }
  0xfc   :  { %v550_v48 = vadd.f32 %v2917_v45, %v509_v43  ;;  %v512_v50 = vadd.f32 %v2898_v44, %v4132_v49 }
  0xfe   :  { %v553_v51 = vadd.f32 %v2920_v47, %v512_v50 }
  0xff   :  { %v631_v52 = vpop.f32.mrb[4].mxu1 }
 0x100   :  { %v3159_v53 = vpop.f32.mrb[5].mxu1 }
 0x101   :  { %v634_v54 = vpop.f32.mrb[6].mxu1 }
 0x102   :  { %v3160_v55 = vpop.f32.mrb[7].mxu1 }
 0x116   :  { %v2937_v56 = vpop.f32.mrb[4].mxu0 }
 0x117   :  { %v2938_v57 = vpop.f32.mrb[5].mxu0 }
 0x118   :  { %v2939_v58 = vadd.f32 %v2938_v57, %v2937_v56  ;;  %v2940_v59 = vpop.f32.mrb[6].mxu0 }
 0x119   :  { %v2941_v60 = vpop.f32.mrb[7].mxu0 }
 0x11a   :  { %v591_v61 = vadd.f32 %v2939_v58, %v550_v48  ;;  %v2942_v62 = vadd.f32 %v2941_v60, %v2940_v59 }
 0x11c   :  { %v632_v63 = vadd.f32 %v631_v52, %v591_v61  ;;  %v594_v33 = vadd.f32 %v2942_v62, %v553_v51 }
 0x11e   :  { %v635_v6 = vadd.f32 %v634_v54, %v594_v33  ;;  %v638_v35 = vmax.f32 %v632_v63, 0.0 }
 0x11f   :  { %v2962_v34 = vpop.f32.mrb[8].mxu1 }
 0x120   :  { %v2963_v0 = vpop.f32.mrb[9].mxu1  ;;  %v639_v31 = vmax.f32 %v635_v6, 0.0 }
 0x121   :  { %v2964_v1 = vadd.f32 %v2963_v0, %v2962_v34  ;;  %v2965_v2 = vpop.f32.mrb[10].mxu1 }
 0x122   :  { %v2966_v3 = vpop.f32.mrb[11].mxu1 }
 0x123   :  { %v2967_v4 = vadd.f32 %v2966_v3, %v2965_v2  ;;  %v1076_v9 = vadd.f32 %v2964_v1, %v4129_v39 }
 0x125   :  { %v1079_v13 = vadd.f32 %v2967_v4, %v4132_v49 }
 0x136   :  { %v2984_v7 = vpop.f32.mrb[8].mxu0 }
 0x137   :  { %v2985_v8 = vpop.f32.mrb[9].mxu0 }
 0x138   :  { %v2986_v10 = vadd.f32 %v2985_v8, %v2984_v7  ;;  %v2987_v11 = vpop.f32.mrb[10].mxu0 }
 0x139   :  { %v2988_v12 = vpop.f32.mrb[11].mxu0 }
 0x13a   :  { %v1117_v5 = vadd.f32 %v2986_v10, %v1076_v9  ;;  %v2989_v14 = vadd.f32 %v2988_v12, %v2987_v11 }
 0x13c   :  { %v1120_v15 = vadd.f32 %v2989_v14, %v1079_v13 }
 0x13e   :  { %v1198_v17 = vpop.f32.mrb[12].mxu0 }
 0x13f   :  { %v3006_v16 = vpop.f32.mrb[12].mxu1  ;;  %v3167_v19 = vpop.f32.mrb[13].mxu0 }
 0x140   :  { %v3007_v18 = vpop.f32.mrb[13].mxu1  ;;  %v1201_v22 = vpop.f32.mrb[14].mxu0 }
 0x141   :  { %v3008_v20 = vadd.f32 %v3007_v18, %v3006_v16  ;;  %v3009_v21 = vpop.f32.mrb[14].mxu1  ;;  %v3168_v24 = vpop.f32.mrb[15].mxu0 }
 0x142   :  { %v3010_v23 = vpop.f32.mrb[15].mxu1 }
 0x143   :  { %v1158_v25 = vadd.f32 %v3008_v20, %v1117_v5  ;;  %v3011_v26 = vadd.f32 %v3010_v23, %v3009_v21 }
 0x145   :  { %v1199_v27 = vadd.f32 %v1198_v17, %v1158_v25  ;;  %v1161_v28 = vadd.f32 %v3011_v26, %v1120_v15 }
 0x147   :  { %v1205_v36 = vmax.f32 %v1199_v27, 0.0  ;;  %v1202_v29 = vadd.f32 %v1201_v22, %v1161_v28 }
 0x149   :  { %v4137_v30 = vmax.f32 %v638_v35, %v1205_v36  ;;  %v1206_v32 = vmax.f32 %v1202_v29, 0.0 }
 0x14b   :  { %v4139_v38 = vmax.f32 %v639_v31, %v1206_v32 }
 0x15e   :  { %v3031_v37 = vpop.f32.mrb[16].mxu0 }
 0x15f   :  { %v3053_v45 = vpop.f32.mrb[16].mxu1  ;;  %v3032_v40 = vpop.f32.mrb[17].mxu0 }
 0x160   :  { %v3054_v41 = vpop.f32.mrb[17].mxu1  ;;  %v3033_v42 = vadd.f32 %v3032_v40, %v3031_v37  ;;  %v3034_v44 = vpop.f32.mrb[18].mxu0 }
 0x161   :  { %v3055_v43 = vadd.f32 %v3054_v41, %v3053_v45  ;;  %v3056_v46 = vpop.f32.mrb[18].mxu1  ;;  %v3035_v47 = vpop.f32.mrb[19].mxu0 }
 0x162   :  { %v3057_v48 = vpop.f32.mrb[19].mxu1  ;;  %v1645_v50 = vadd.f32 %v3033_v42, %v4129_v39  ;;  %v3036_v51 = vadd.f32 %v3035_v47, %v3034_v44 }
 0x163   :  { %v3058_v52 = vadd.f32 %v3057_v48, %v3056_v46 }
 0x164   :  { %v1686_v53 = vadd.f32 %v3055_v43, %v1645_v50  ;;  %v1648_v54 = vadd.f32 %v3036_v51, %v4132_v49 }
 0x166   :  { %v1689_v55 = vadd.f32 %v3058_v52, %v1648_v54 }
 0x167   :  { %v1767_v56 = vpop.f32.mrb[20].mxu1 }
 0x168   :  { %v3175_v57 = vpop.f32.mrb[21].mxu1 }
 0x169   :  { %v1770_v58 = vpop.f32.mrb[22].mxu1 }
 0x16a   :  { %v3176_v59 = vpop.f32.mrb[23].mxu1 }
 0x17e   :  { %v3075_v60 = vpop.f32.mrb[20].mxu0 }
 0x17f   :  { %v3076_v61 = vpop.f32.mrb[21].mxu0 }
 0x180   :  { %v3077_v62 = vadd.f32 %v3076_v61, %v3075_v60  ;;  %v3078_v63 = vpop.f32.mrb[22].mxu0 }
 0x181   :  { %v3079_v33 = vpop.f32.mrb[23].mxu0 }
 0x182   :  { %v1727_v6 = vadd.f32 %v3077_v62, %v1686_v53  ;;  %v3080_v34 = vadd.f32 %v3079_v33, %v3078_v63 }
 0x184   :  { %v1768_v0 = vadd.f32 %v1767_v56, %v1727_v6  ;;  %v1730_v1 = vadd.f32 %v3080_v34, %v1689_v55 }
 0x186   :  { %v1771_v2 = vadd.f32 %v1770_v58, %v1730_v1  ;;  %v1774_v31 = vmax.f32 %v1768_v0, 0.0 }
 0x187   :  { %v3100_v3 = vpop.f32.mrb[24].mxu1 }
 0x188   :  { %v3101_v4 = vpop.f32.mrb[25].mxu1  ;;  %v1775_v45 = vmax.f32 %v1771_v2, 0.0 }
 0x189   :  { %v3102_v7 = vadd.f32 %v3101_v4, %v3100_v3  ;;  %v3103_v8 = vpop.f32.mrb[26].mxu1 }
 0x18a   :  { %v3104_v9 = vpop.f32.mrb[27].mxu1 }
 0x18b   :  { %v3105_v10 = vadd.f32 %v3104_v9, %v3103_v8  ;;  %v2212_v13 = vadd.f32 %v3102_v7, %v4129_v39 }
 0x18d   :  { %v2215_v16 = vadd.f32 %v3105_v10, %v4132_v49 }
 0x19e   :  { %v3122_v11 = vpop.f32.mrb[24].mxu0 }
 0x19f   :  { %v3123_v12 = vpop.f32.mrb[25].mxu0 }
 0x1a0   :  { %v3124_v5 = vadd.f32 %v3123_v12, %v3122_v11  ;;  %v3125_v14 = vpop.f32.mrb[26].mxu0 }
 0x1a1   :  { %v3126_v15 = vpop.f32.mrb[27].mxu0 }
 0x1a2   :  { %v2253_v17 = vadd.f32 %v3124_v5, %v2212_v13  ;;  %v3127_v18 = vadd.f32 %v3126_v15, %v3125_v14 }
 0x1a4   :  { %v2256_v19 = vadd.f32 %v3127_v18, %v2215_v16 }
 0x1a6   :  { %v2334_v21 = vpop.f32.mrb[28].mxu0 }
 0x1a7   :  { %v3144_v20 = vpop.f32.mrb[28].mxu1  ;;  %v3183_v23 = vpop.f32.mrb[29].mxu0 }
 0x1a8   :  { %v3145_v22 = vpop.f32.mrb[29].mxu1  ;;  %v2337_v26 = vpop.f32.mrb[30].mxu0 }
 0x1a9   :  { %v3146_v24 = vadd.f32 %v3145_v22, %v3144_v20  ;;  %v3147_v25 = vpop.f32.mrb[30].mxu1  ;;  %v3184_v28 = vpop.f32.mrb[31].mxu0 }
 0x1aa   :  { %v3148_v27 = vpop.f32.mrb[31].mxu1 }
 0x1ab   :  { %v2294_v35 = vadd.f32 %v3146_v24, %v2253_v17  ;;  %v3149_v36 = vadd.f32 %v3148_v27, %v3147_v25 }
 0x1ad   :  { %v2335_v39 = vadd.f32 %v2334_v21, %v2294_v35  ;;  %v2297_v29 = vadd.f32 %v3149_v36, %v2256_v19 }
 0x1af   :  { %v2341_v32 = vmax.f32 %v2335_v39, 0.0  ;;  %v2338_v37 = vadd.f32 %v2337_v26, %v2297_v29 }
 0x1b1   :  { %v2343_v49 = vmax.f32 %v1774_v31, %v2341_v32  ;;  %v2342_v40 = vmax.f32 %v2338_v37, 0.0 }
 0x1b3   :  { %v2345_v41 = vmax.f32 %v4137_v30, %v2343_v49  ;;  %v2344_v42 = vmax.f32 %v1775_v45, %v2342_v40 }
 0x1b5   :  { %v2875_v43 = vpack.c.bf16 %v2345_v41, %v2345_v41  ;;  %v2346_v44 = vmax.f32 %v4139_v38, %v2344_v42 }
 0x1b7   :  { %2356 = vst.msk [vmem:[%s4156_s3] sm:$0xf] %vm2355_vm2, %v2875_v43  ;;  %v2876_v46 = vpack.c.bf16 %v2346_v44, %v2346_v44 }
 0x1b9   :  { %2357 = vst.msk [vmem:[%s4156_s3 + $0x4] sm:$0xf] %vm2355_vm2, %v2876_v46 }

// kernel: mycnn_forward.5
= control target key start
LH: loop header
LB: loop body
LE: loop exit
PB: predicated region body
PF: predicated region fallthrough
CT: control target
= control target key end

     0   :  { %v667_v1 = vmov 0   ;;  %v98_v21 = vlaneseq  ;;  %v668_v26 = vmov 1966171168   ;;  %s838_s0 = inlined_call_operand.vmem [shape: bf16[2,400], index: 0, kind: input, shape index: {}]   ;;  %s839_s1 = inlined_call_operand.vmem [shape: bf16[400,64], index: 1, kind: input, shape index: {}]   ;;  %s840_s2 = inlined_call_operand.vmem [shape: f32[1,64], index: 2, kind: input, shape index: {}]   ;;  %s841_s3 = inlined_call_operand.vmem [shape: bf16[64,32], index: 3, kind: input, shape index: {}]   ;;  %s842_s4 = inlined_call_operand.vmem [shape: f32[1,32], index: 4, kind: input, shape index: {}]   ;;  %s843_s5 = inlined_call_operand.vmem [shape: bf16[32,10], index: 5, kind: input, shape index: {}]   ;;  %s844_s6 = inlined_call_operand.vmem [shape: f32[1,10], index: 6, kind: input, shape index: {}]   ;;  %s845_s7 = inlined_call_operand.hbm [shape: f32[2,10], index: 7, kind: output, shape index: {}]  }
   0x1   :  { %v612_v0 = vld [vmem:[%s839_s1 + $0x40] sm:$0xff]   ;;  %308 = vmatprep.subr.bf16.mxu1 %v667_v1  ;;  %v615_v4 = vld [vmem:[%s839_s1 + $0x48] sm:$0xff]   ;;  %v618_v7 = vld [vmem:[%s839_s1 + $0x50] sm:$0xff]   ;;  %v96_v27 = vunpack.c.l.s4 %v668_v26 }
   0x2   :  { %v613_v2 = vld [vmem:[%s839_s1 + $0x80] sm:$0xff]   ;;  %557 = vmatprep.subr.bf16.mxu0 %v612_v0  ;;  %v616_v5 = vld [vmem:[%s839_s1 + $0x88] sm:$0xff]   ;;  %v619_v8 = vld [vmem:[%s839_s1 + $0x90] sm:$0xff]   ;;  %v99_v28 = vshrl.u32 %v98_v21, 7 }
   0x3   :  { %v614_v3 = vld [vmem:[%s839_s1] sm:$0xff]   ;;  %309 = vmatpush1.bf16.msra.mxu1 %v613_v2  ;;  %v617_v6 = vld [vmem:[%s839_s1 + $0x8] sm:$0xff]   ;;  %v620_v9 = vld [vmem:[%s839_s1 + $0x10] sm:$0xff]   ;;  %v97_v31 = vunpack.c.0.s8 %v96_v27 }
   0x4   :  { %558 = vmatpush3.bf16.msra.mxu0 %v614_v3  ;;  %310 = vmatprep.subr.bf16.mxu1 %v667_v1  ;;  %v621_v10 = vld [vmem:[%s839_s1 + $0x58] sm:$0xff]   ;;  %v624_v13 = vld [vmem:[%s839_s1 + $0x60] sm:$0xff]   ;;  %v627_v16 = vld [vmem:[%s839_s1 + $0x68] sm:$0xff]  }
   0x5   :  { %559 = vmatprep.subr.bf16.mxu0 %v615_v4  ;;  %v622_v11 = vld [vmem:[%s839_s1 + $0x98] sm:$0xff]   ;;  %v625_v14 = vld [vmem:[%s839_s1 + $0xa0] sm:$0xff]   ;;  %v628_v17 = vld [vmem:[%s839_s1 + $0xa8] sm:$0xff]   ;;  %v100_v32 = vsub.s32 %v97_v31, %v99_v28 }
   0x6   :  { %v623_v12 = vld [vmem:[%s839_s1 + $0x18] sm:$0xff]   ;;  %v626_v15 = vld [vmem:[%s839_s1 + $0x20] sm:$0xff]   ;;  %v629_v18 = vld [vmem:[%s839_s1 + $0x28] sm:$0xff]  }
   0x7   :  { %311 = vmatpush1.bf16.msra.mxu1 %v616_v5  ;;  %v630_v19 = vld [vmem:[%s839_s1 + $0x70] sm:$0xff]   ;;  %v633_v23 = vld [vmem:[%s839_s1 + $0x78] sm:$0xff]   ;;  %v520_v24 = vld.sshfl [vmem:[%s838_s0] sm:$0x33 pattern:$0x75316420] }
   0x8   :  { %560 = vmatpush3.bf16.msra.mxu0 %v617_v6  ;;  %312 = vmatprep.subr.bf16.mxu1 %v667_v1  ;;  %v631_v20 = vld [vmem:[%s839_s1 + $0xb0] sm:$0xff]   ;;  %v634_v25 = vld [vmem:[%s839_s1 + $0xb8] sm:$0xff]   ;;  %v94_v30 = vcombine.high %v520_v24, %v520_v24 }
   0x9   :  { %561 = vmatprep.subr.bf16.mxu0 %v618_v7  ;;  %v632_v22 = vld [vmem:[%s839_s1 + $0x30] sm:$0xff]   ;;  %v635_v29 = vld [vmem:[%s839_s1 + $0x38] sm:$0xff]  }
   0xb   :  { %313 = vmatpush1.bf16.msra.mxu1 %v619_v8 }
   0xc   :  { %562 = vmatpush3.bf16.msra.mxu0 %v620_v9  ;;  %314 = vmatprep.subr.bf16.mxu1 %v667_v1 }
   0xd   :  { %563 = vmatprep.subr.bf16.mxu0 %v621_v10 }
   0xf   :  { %315 = vmatpush1.bf16.msra.mxu1 %v622_v11 }
  0x10   :  { %564 = vmatpush3.bf16.msra.mxu0 %v623_v12  ;;  %316 = vmatprep.subr.bf16.mxu1 %v667_v1 }
  0x11   :  { %565 = vmatprep.subr.bf16.mxu0 %v624_v13 }
  0x13   :  { %317 = vmatpush1.bf16.msra.mxu1 %v625_v14 }
  0x14   :  { %566 = vmatpush3.bf16.msra.mxu0 %v626_v15  ;;  %318 = vmatprep.subr.bf16.mxu1 %v667_v1 }
  0x15   :  { %567 = vmatprep.subr.bf16.mxu0 %v627_v16 }
  0x17   :  { %319 = vmatpush1.bf16.msra.mxu1 %v628_v17 }
  0x18   :  { %568 = vmatpush3.bf16.msra.mxu0 %v629_v18  ;;  %320 = vmatprep.subr.bf16.mxu1 %v667_v1 }
  0x19   :  { %569 = vmatprep.subr.bf16.mxu0 %v630_v19 }
  0x1b   :  { %321 = vmatpush1.bf16.msra.mxu1 %v631_v20 }
  0x1c   :  { %570 = vmatpush3.bf16.msra.mxu0 %v632_v22  ;;  %322 = vmatprep.subr.bf16.mxu1 %v667_v1 }
  0x1d   :  { %571 = vmatprep.subr.bf16.mxu0 %v633_v23 }
  0x1e   :  { %12 = vsyncpa [#allocation3], 0  ;;  %v108_v33 = vrot.slane %v94_v30, %v100_v32  ;;  %v101_v34 = vrot.slane %v520_v24, %v100_v32  ;;  %v636_v35 = vld [vmem:[%s839_s1 + $0xc0] sm:$0xff]   ;;  %vm264_vm0 = vcmask 130048   ;;  %v669_v38 = vmov 0.0   ;;  %v638_v40 = vld [vmem:[%s841_s3 + $0x8] sm:$0xff]  }
  0x1f   :  { %323 = vmatpush1.bf16.msra.mxu1 %v634_v25  ;;  %v637_v36 = vld [vmem:[%s841_s3] sm:$0xff]   ;;  %v639_v41 = vld [vmem:[%s841_s3 + $0x10] sm:$0xff]   ;;  %v640_v42 = vld [vmem:[%s841_s3 + $0x18] sm:$0xff]   ;;  %vm670_vm1 = vmmov 0   ;;  %vm389_vm2 = vcmask 523264   ;;  %vm458_vm3 = vcmask 261120  }
  0x20   :  { %572 = vmatpush3.bf16.msra.mxu0 %v635_v29  ;;  %324 = vmatprep.subr.bf16.mxu1 %v667_v1  ;;  %v110_v37 = vcombine.high %v108_v33, %v108_v33  ;;  %v109_v39 = vcombine.high %v101_v34, %v101_v34  ;;  %v641_v43 = vld [vmem:[%s843_s5] sm:$0xff]   ;;  %v642_v58 = vld [vmem:[%s843_s5 + $0x8] sm:$0xff]   ;;  %s671_s5 = smov [#allocation2]   ;;  %vm503_vm4 = vcmask 74752  }
  0x21   :  { %300 = vmatprep.mubr.bf16.mxu0 %v108_v33  ;;  %587 = vmatprep.subr.bf16.mxu0 %v669_v38  ;;  %v519_v46 = vld [vmem:[%s840_s2] ss:$0 sm:$0xff]  ;;  %s511_s21 = sshll.u32 %s671_s5, 4  ;;  %s512_s21 = int_to_ptr.vmem [resolvable:$true] %s511_s21 }
  0x22   :  { %546 = vmatprep.mubr.msk.bf16.mxu1 %vm264_vm0, %v110_v37  ;;  %v547_v59 = vld [vmem:[%s842_s4] ss:$0 sm:$0xff]  ;;  %s643_s4 = scalar_lea.vmem %s512_s21, 32  ;;  %p648_p1 = scmp.lt.s32.totalorder %s512_s21, %s512_s21 }
  0x23   :  { %301 = vmatmul.mubr.bf16.vlgmr.msra.gmra.mrb[0].mxu0 %v101_v34  ;;  %325 = vmatpush1.bf16.msra.mxu1 %v636_v35  ;;  %v553_v3 = vld [vmem:[%s844_s6] ss:$0 sm:$0xff]  ;;  %p644_p0 = scmp.ne.s32.totalorder %s512_s21, %s643_s4  ;;  %p649_p2 = scmp.lt.s32.totalorder %s643_s4, %s643_s4 }
  0x24   :  { %588 = vmatpush3.bf16.msra.mxu0 %v637_v36  ;;  %599 = vmatprep.subr.bf16.mxu1 %v669_v38 }
  0x25   :  { %589 = vmatprep.subr.bf16.mxu0 %v669_v38  ;;  %595 = vmatprep.mubr.msk.bf16.mxu0 %vm670_vm1, %v669_v38  ;;  %p650_p3 = por %p649_p2, %p648_p1 }
  0x26   :  { %341 = vmatmul.mubr.bf16.vlgmr.msra.gmra.mrb[0].mxu1 %v109_v39 }
  0x27   :  { %603 = vmatprep.mubr.msk.bf16.mxu1 %vm670_vm1, %v669_v38  ;;  %600 = vmatpush3.bf16.msra.mxu1 %v641_v43  ;;  %p651_p4 = pnand %p650_p3, %p644_p0 }
  0x28   :  { %590 = vmatpush3.bf16.msra.mxu0 %v638_v40  ;;  %601 = vmatprep.subr.bf16.mxu1 %v669_v38 }
  0x29   :  { %591 = vmatprep.subr.bf16.mxu0 %v669_v38 }
  0x2b   :  { %602 = vmatpush3.bf16.msra.mxu1 %v642_v58 }
  0x2c   :  { %592 = vmatpush3.bf16.msra.mxu0 %v639_v41 }
  0x2d   :  { %593 = vmatprep.subr.bf16.mxu0 %v669_v38 }
  0x30   :  { %594 = vmatpush3.bf16.msra.mxu0 %v640_v42 }
  0xf6   :  { %v573_v44 = vpop.f32.mrb[0].mxu0 }
  0xf7   :  { %v574_v45 = vpop.f32.mrb[1].mxu0 }
  0xf8   :  { %v575_v47 = vadd.f32 %v574_v45, %v573_v44  ;;  %v576_v48 = vpop.f32.mrb[2].mxu0 }
  0xf9   :  { %v577_v49 = vpop.f32.mrb[3].mxu0  ;;  %v342_v50 = vpop.f32.mrb[0].mxu1 }
  0xfa   :  { %v303_v51 = vadd.f32 %v575_v47, %v519_v46  ;;  %v344_v52 = vpop.f32.mrb[1].mxu1 }
  0xfb   :  { %v345_v53 = vpop.f32.mrb[2].mxu1 }
  0xfc   :  { %v343_v54 = vadd.f32 %v342_v50, %v303_v51  ;;  %v346_v55 = vpop.f32.mrb[3].mxu1 }
  0xfe   :  { %v348_v56 = vmax.f32 %v343_v54, 0.0 }
 0x100   :  { %v349_v57 = vpack.c.bf16 %v348_v56, %v348_v56 }
 0x102   :  { %596 = vmatmul.mubr.msk.bf16.vlgmr.msra.gmra.mrb[4].mxu0 %vm389_vm2, %v349_v57 }
 0x1d5   :  { %v427_v60 = vpop.f32.mrb[4].mxu0 }
 0x1d6   :  { %v428_v61 = vadd.f32 %v547_v59, %v427_v60  ;;  %v597_v62 = vpop.f32.mrb[5].mxu0 }
 0x1d7   :  { %v430_v63 = vpop.f32.mrb[6].mxu0 }
 0x1d8   :  { %v433_v0 = vmax.f32 %v428_v61, 0.0  ;;  %v598_v1 = vpop.f32.mrb[7].mxu0 }
 0x1da   :  { %v434_v2 = vpack.c.bf16 %v433_v0, %v433_v0 }
 0x1dc   :  { %604 = vmatmul.mubr.msk.bf16.vlgmr.msra.gmra.mrb[4].mxu1 %vm458_vm3, %v434_v2 }
 0x2af   :  { %v496_v4 = vpop.f32.mrb[4].mxu1 }
 0x2b0   :  { %v497_v5 = vadd.f32 %v553_v3, %v496_v4  ;;  %v605_v6 = vpop.f32.mrb[5].mxu1 }
 0x2b1   :  { %v499_v7 = vpop.f32.mrb[6].mxu1 }
 0x2b2   :  { %v502_v8 = vmax.f32 %v497_v5, 0.0  ;;  %v606_v9 = vpop.f32.mrb[7].mxu1 }
 0x2b4   :  { %504 = vst.msk [vmem:[#allocation2] sm:$0x3] %vm503_vm4, %v502_v8 }
 0x2b5   :  { %654 = shalt.err (!%p651_p4)
}
 0x2b6   :  { %s655_s23 = scalar_lea.hbm %s845_s7, 32 }
 0x2b7   :  { %p656_p5 = scmp.ne.s32.totalorder %s845_s7, %s655_s23  ;;  %p659_p6 = scmp.lt.u32.totalorder %s655_s23, %s845_s7 }
 0x2b9   :  { %p661_p7 = pnand %p659_p6, %p656_p5 }
 0x2bb   :  { %664 = shalt.err (!%p661_p7)
}
 0x2bc   :  { %514 = dma.vmem_to_hbm [thread:$0]  %s512_s21, 32, %s845_s7, [#allocation3]  }
 0x2bd   :  { %665 = dma.done.wait [#allocation3], 32  }
 0x2be   :  { %666 = vsyncadd [#allocation3], 4294967264 }
 0x2bf   :  { %518 = vsyncpa [#allocation3], 1 }

</bundles_post_ra>
